<compile_context>
chip_gen: v6e
topology: v6e:2x2x1
jax: 0.10.0
libtpu: 0.0.40
codegen_flags: <defaults>
</compile_context>

<pallas_src>
import functools

import jax
import jax.numpy as jnp
from jax.experimental import pallas as pl
from jax.experimental.pallas import tpu as pltpu


NEG_SLOPE = 0.2
_ROW_CAP = 512   # row-tile cap (multiple of 8) for row-tiled kernels (512 ~ 85% HBM roofline)
_NEG_BIG = -1e30


def _row_block(n, cap=_ROW_CAP):
    # Full-array rows when small (valid block: equals array dim), else a multiple-of-8 tile.
    return n if n <= cap else cap


# ----------------------------- Pallas kernels -----------------------------

def _linear_kernel(x_ref, w_ref, b_ref, o_ref):
    o_ref[...] = jnp.dot(x_ref[...], w_ref[...],
                         preferred_element_type=jnp.float32) + b_ref[...]


def pallas_linear(x, w, b):
    """Row-tiled Linear: x [N, Din], w [Din, Dout], b [Dout] -> [N, Dout]."""
    n, din = x.shape
    dout = w.shape[1]
    tm = _row_block(n)
    return pl.pallas_call(
        _linear_kernel,
        out_shape=jax.ShapeDtypeStruct((n, dout), jnp.float32),
        grid=(pl.cdiv(n, tm),),
        in_specs=[
            pl.BlockSpec((tm, din), lambda i: (i, 0)),
            pl.BlockSpec((din, dout), lambda i: (0, 0)),
            pl.BlockSpec((1, dout), lambda i: (0, 0)),
        ],
        out_specs=pl.BlockSpec((tm, dout), lambda i: (i, 0)),
        compiler_params=pltpu.CompilerParams(dimension_semantics=("parallel",)),
    )(x, w, b.reshape(1, dout))


def _prologue_core(h, wp_ref, bp_ref, wa_ref, xp_ref, lg_ref):
    h = jnp.maximum(h, 0.0)                                               # fused ReLU
    xp = jnp.dot(h, wp_ref[...], preferred_element_type=jnp.float32) + bp_ref[...]
    xp_ref[...] = xp                                                      # projected features
    # all alpha_src / alpha_dst logits for this node type in one matmul
    lg_ref[...] = jnp.dot(xp, wa_ref[...], preferred_element_type=jnp.float32)


def _prologue_pre_kernel(x_ref, w1_ref, b1_ref, wp_ref, bp_ref, wa_ref, xp_ref, lg_ref):
    h = jnp.dot(x_ref[...], w1_ref[...], preferred_element_type=jnp.float32) + b1_ref[...]
    _prologue_core(h, wp_ref, bp_ref, wa_ref, xp_ref, lg_ref)


def _prologue_kernel(x_ref, wp_ref, bp_ref, wa_ref, xp_ref, lg_ref):
    _prologue_core(x_ref[...], wp_ref, bp_ref, wa_ref, xp_ref, lg_ref)


def pallas_fused_node_prologue(x, proj_w, proj_b, attn_mat, pre_w=None, pre_b=None):
    """Fused per-node-type prologue.

    has_pre:  xp = (relu(x @ pre_w + pre_b)) @ proj_w + proj_b      (conv0: pre_lin + ReLU)
    no pre:   xp = relu(x) @ proj_w + proj_b                        (conv1: inter-layer ReLU)
    Also returns logits = xp @ attn_mat  (stacked attention-vector columns) so the
    per-edge-type alpha_src / alpha_dst reductions are fused into the same kernel.
    """
    n, din = x.shape
    c = proj_w.shape[1]
    a = attn_mat.shape[1]
    tm = _row_block(n)
    has_pre = pre_w is not None

    in_specs = [pl.BlockSpec((tm, din), lambda i: (i, 0))]
    args = [x]
    if has_pre:
        in_specs += [pl.BlockSpec((pre_w.shape[0], c), lambda i: (0, 0)),
                     pl.BlockSpec((1, c), lambda i: (0, 0))]
        args += [pre_w, pre_b.reshape(1, c)]
    in_specs += [pl.BlockSpec((proj_w.shape[0], c), lambda i: (0, 0)),
                 pl.BlockSpec((1, c), lambda i: (0, 0)),
                 pl.BlockSpec((c, a), lambda i: (0, 0))]
    args += [proj_w, proj_b.reshape(1, c), attn_mat]

    kernel = _prologue_pre_kernel if has_pre else _prologue_kernel
    return pl.pallas_call(
        kernel,
        out_shape=(jax.ShapeDtypeStruct((n, c), jnp.float32),
                   jax.ShapeDtypeStruct((n, a), jnp.float32)),
        grid=(pl.cdiv(n, tm),),
        in_specs=in_specs,
        out_specs=(pl.BlockSpec((tm, c), lambda i: (i, 0)),
                   pl.BlockSpec((tm, a), lambda i: (i, 0))),
        compiler_params=pltpu.CompilerParams(dimension_semantics=("parallel",)),
    )(*args)


def _han_attn_kernel(xs_ref, ast_ref, adt_ref, bias_ref, gate_ref, o_ref, *,
                     num_heads, head_dim, negative_slope):
    # One grid step == one edge type (leading block dim of size 1).
    xs = xs_ref[0]        # [Ns, C]   projected source features (lane-dense, heads on lanes)
    ast = ast_ref[0]      # [H, Ns]   alpha_src logits
    adt = adt_ref[0]      # [Nd, H]   alpha_dst logits
    bias = bias_ref[0]    # [Nd, Ns]  additive mask bias (0 where edge exists, -1e30 otherwise)
    gate = gate_ref[0]    # [Nd, 1]   1.0 if dst has >= 1 incoming edge else 0.0 (precomputed)

    outs = []
    for h in range(num_heads):                        # static unroll; heads are few
        s = adt[:, h:h + 1] + ast[h:h + 1, :]         # [Nd, Ns]
        s = jnp.maximum(s, negative_slope * s)        # leaky_relu(0.2) as a single max
        s = s + bias                                  # mask as one add (no where per head)
        m = jnp.max(s, axis=-1, keepdims=True)        # [Nd, 1]
        p = jnp.exp(s - m)                            # masked entries underflow to 0
        denom = jnp.sum(p, axis=-1, keepdims=True)
        p = p * (pl.reciprocal(denom, approx=True) * gate)   # EUP recip; no-edge dst -> 0
        xh = xs if num_heads == 1 else xs[:, h * head_dim:(h + 1) * head_dim]
        # For H==1 this is a single full-width [Nd,Ns]@[Ns,C] MXU contraction.
        outs.append(jnp.dot(p, xh, preferred_element_type=jnp.float32))
    out = outs[0] if num_heads == 1 else jnp.concatenate(outs, axis=-1)
    o_ref[0] = jnp.maximum(out, 0.0)                  # fused per-edge-type ReLU, lane-dense store


def pallas_han_attention(xs_pad, ast_pad, adt_pad, bias_pad, gate_pad, num_heads):
    """All edge types in ONE kernel: leading grid axis over edge types ('parallel')."""
    n_et, ns, c = xs_pad.shape
    nd = bias_pad.shape[1]
    d = c // num_heads
    return pl.pallas_call(
        functools.partial(_han_attn_kernel, num_heads=num_heads, head_dim=d,
                          negative_slope=NEG_SLOPE),
        out_shape=jax.ShapeDtypeStruct((n_et, nd, c), jnp.float32),
        grid=(n_et,),
        in_specs=[
            pl.BlockSpec((1, ns, c), lambda e: (e, 0, 0)),
            pl.BlockSpec((1, num_heads, ns), lambda e: (e, 0, 0)),
            pl.BlockSpec((1, nd, num_heads), lambda e: (e, 0, 0)),
            pl.BlockSpec((1, nd, ns), lambda e: (e, 0, 0)),
            pl.BlockSpec((1, nd, 1), lambda e: (e, 0, 0)),
        ],
        out_specs=pl.BlockSpec((1, nd, c), lambda e: (e, 0, 0)),
        compiler_params=pltpu.CompilerParams(dimension_semantics=("parallel",)),
    )(xs_pad, ast_pad, adt_pad, bias_pad, gate_pad)


def _semantic_kernel(x_ref, kw_ref, kb_ref, q_ref, o_ref, *, num_rel, n):
    # PyG `group`: score_e = mean_n( sum_c( q * tanh(k_lin(x_e)) ) ); softmax over e;
    # out = sum_e softmax_e * x_e.  Input is the relations concatenated on rows [E*N, C]
    # so k_lin is ONE stacked matmul + ONE tanh pass.
    flat = x_ref[...]                                             # [E*N, C]
    k = jnp.tanh(jnp.dot(flat, kw_ref[...],
                         preferred_element_type=jnp.float32) + kb_ref[...])
    s = jnp.sum(k * q_ref[...], axis=-1, keepdims=True)           # [E*N, 1]
    scores = [jnp.mean(s[e * n:(e + 1) * n], axis=0, keepdims=True)
              for e in range(num_rel)]                            # each [1, 1]
    m = scores[0]
    for sc in scores[1:]:
        m = jnp.maximum(m, sc)
    exps = [jnp.exp(sc - m) for sc in scores]
    denom = exps[0]
    for ex in exps[1:]:
        denom = denom + ex
    inv = pl.reciprocal(denom, approx=True)
    out = (exps[0] * inv) * flat[0:n, :]
    for e in range(1, num_rel):
        out = out + (exps[e] * inv) * flat[e * n:(e + 1) * n, :]
    o_ref[...] = out


def pallas_semantic_attention(stacked2d, num_rel, k_w, k_b, q):
    # TODO(synk): at scale, row-tile this (score-reduction pass over an 'arbitrary' axis +
    # small combine kernel) instead of holding the full [E*N, C] tensor in VMEM.
    en, c = stacked2d.shape
    n = en // num_rel
    return pl.pallas_call(
        functools.partial(_semantic_kernel, num_rel=num_rel, n=n),
        out_shape=jax.ShapeDtypeStruct((n, c), jnp.float32),
        grid=(1,),
        in_specs=[
            pl.BlockSpec((en, c), lambda i: (0, 0)),
            pl.BlockSpec((c, c), lambda i: (0, 0)),
            pl.BlockSpec((1, c), lambda i: (0, 0)),
            pl.BlockSpec((1, c), lambda i: (0, 0)),
        ],
        out_specs=pl.BlockSpec((n, c), lambda i: (0, 0)),
        compiler_params=pltpu.CompilerParams(dimension_semantics=("arbitrary",)),
    )(stacked2d, k_w, k_b.reshape(1, c), q.reshape(1, c))


# ----------------------------- graph preprocessing -----------------------------

def build_edge_bias(edge_index_dict, edge_types, num_nodes):
    """Precompute, ONCE per graph (outside the jitted forward), the additive attention
    bias (0 / -1e30) and per-dst has-edge gate, padded to max src/dst counts over edge
    types.  Both conv layers reuse these (edge structure is identical across layers)."""
    n_et = len(edge_types)
    ns_max = max(num_nodes[et[0]] for et in edge_types)
    nd_max = max(num_nodes[et[2]] for et in edge_types)
    bias = jnp.full((n_et, nd_max, ns_max), _NEG_BIG, jnp.float32)
    gate = jnp.zeros((n_et, nd_max, 1), jnp.float32)
    for e, et in enumerate(edge_types):
        src, _, dst = et
        ei = edge_index_dict[et]
        ns, nd = num_nodes[src], num_nodes[dst]
        adj = jnp.zeros((nd, ns), jnp.float32).at[ei[1], ei[0]].set(1.0)
        bias = bias.at[e, :nd, :ns].set(jnp.where(adj > 0, 0.0, _NEG_BIG))
        gate = gate.at[e, :nd, 0].set((jnp.sum(adj, axis=1) > 0).astype(jnp.float32))
    return bias, gate


# ----------------------------- HANConv / model -----------------------------

def _logit_columns(lin):
    """lin [H, D] -> [H*D, H]: column h holds lin[h] at rows h*D:(h+1)*D (block-diagonal)."""
    h, d = lin.shape
    cols = jnp.zeros((h * d, h), jnp.float32)
    for i in range(h):
        cols = cols.at[i * d:(i + 1) * d, i].set(lin[i])
    return cols


def han_conv_forward(p, x_dict, bias_pad, gate_pad, node_types, edge_types, num_heads,
                     pre_w=None, pre_b=None):
    c = p["q"].shape[0]
    nd_max, ns_max = bias_pad.shape[1], bias_pad.shape[2]

    # (edge_type, role) columns handled by each node type.
    roles = {nt: [] for nt in node_types}
    for et in edge_types:
        key = "__".join(et)
        roles[et[0]].append((key, "src"))
        roles[et[2]].append((key, "dst"))

    attn_mats, col_off = {}, {}
    for nt in node_types:
        cols, offs, off = [], {}, 0
        for key, role in roles[nt]:
            lin = p["lin_src"][key] if role == "src" else p["lin_dst"][key]
            cols.append(_logit_columns(lin))
            offs[(key, role)] = off
            off += num_heads
        if not cols:  # node type participating in no edge type
            cols = [jnp.zeros((c, 1), jnp.float32)]
        attn_mats[nt] = jnp.concatenate(cols, axis=1)
        col_off[nt] = offs

    # Fused per-node-type prologue: (pre_lin?) + ReLU + proj + all attention logits.
    x_proj, logits = {}, {}
    for nt in node_types:
        pw = pre_w[nt] if pre_w is not None else None
        pb = pre_b[nt] if pre_b is not None else None
        xp, lg = pallas_fused_node_prologue(x_dict[nt], p["proj_w"][nt], p["proj_b"][nt],
                                            attn_mats[nt], pw, pb)
        x_proj[nt], logits[nt] = xp, lg

    # Batch all edge types into one attention launch; pad with jnp.pad + stack
    # (no read-modify-write scatters).  No head-major transpose of the feature tensor.
    xs_list, ast_list, adt_list = [], [], []
    for et in edge_types:
        src, _, dst = et
        key = "__".join(et)
        ns, nd = x_proj[src].shape[0], x_proj[dst].shape[0]
        o_s = col_off[src][(key, "src")]
        o_d = col_off[dst][(key, "dst")]
        xs_list.append(jnp.pad(x_proj[src], ((0, ns_max - ns), (0, 0))))
        ast_list.append(jnp.pad(logits[src][:, o_s:o_s + num_heads].T,
                                ((0, 0), (0, ns_max - ns))))
        adt_list.append(jnp.pad(logits[dst][:, o_d:o_d + num_heads],
                                ((0, nd_max - nd), (0, 0))))
    xs_pad = jnp.stack(xs_list)     # [E, Ns_max, C]
    ast_pad = jnp.stack(ast_list)   # [E, H, Ns_max]
    adt_pad = jnp.stack(adt_list)   # [E, Nd_max, H]

    out_pad = pallas_han_attention(xs_pad, ast_pad, adt_pad, bias_pad, gate_pad,
                                   num_heads)   # [E, Nd_max, C] lane-dense

    outs = {nt: [] for nt in node_types}
    for e, et in enumerate(edge_types):
        dst = et[2]
        nd = x_proj[dst].shape[0]
        outs[dst].append(out_pad[e, :nd, :])    # already [Nd, C]; no transpose needed

    # Semantic-level attention (fused kernel per node type).
    out_dict = {}
    for nt in node_types:
        xs = outs[nt]
        if not xs:
            # TODO(synk): node type with no incoming edge type -> None (matches PyG; only
            # safe if such a type is never fed into a following layer).
            out_dict[nt] = None
            continue
        if len(xs) == 1:
            out_dict[nt] = xs[0]                # softmax over one relation == 1.0 exactly
            continue
        stacked2d = jnp.concatenate(xs, axis=0)  # [E_nt * N, C]
        out_dict[nt] = pallas_semantic_attention(stacked2d, len(xs),
                                                 p["k_w"], p["k_b"], p["q"])
    return out_dict


def hgraph_nn_forward(params, x_dict, bias_pad, gate_pad, node_types, edge_types,
                      target_node_type, num_heads):
    # conv0: pre_lin + ReLU fused into its prologue kernels (dropout omitted: eval mode).
    h = han_conv_forward(params["conv0"], x_dict, bias_pad, gate_pad, node_types,
                         edge_types, num_heads, pre_w=params["pre_w"], pre_b=params["pre_b"])
    # conv1: inter-layer ReLU fused into conv1's prologue kernels.
    h = han_conv_forward(params["conv1"], h, bias_pad, gate_pad, node_types,
                         edge_types, num_heads)
    # readout on target node type
    return pallas_linear(h[target_node_type], params["readout_w"], params["readout_b"])


# ----------------------------- setup / demo -----------------------------

if __name__ == "__main__":
    node_types = ["author", "paper"]
    edge_types = [("author", "writes", "paper"),
                  ("paper", "cites", "paper"),
                  ("paper", "rev_writes", "author")]
    in_dim = {"author": 6, "paper": 12}
    num_nodes = {"author": 8, "paper": 16}
    hidden_dim, out_dim, num_heads = 32, 8, 1
    target = "paper"

    keys = iter(jax.random.split(jax.random.PRNGKey(0), 64))

    def lin_params(din, dout):
        w = jax.random.normal(next(keys), (din, dout), jnp.float32) / jnp.sqrt(din)
        b = jax.random.normal(next(keys), (dout,), jnp.float32) * 0.01
        return w, b

    def hanconv_params(c_in, c_out):
        d = c_out // num_heads
        pw, pb, ls, ld = {}, {}, {}, {}
        for nt in node_types:
            pw[nt], pb[nt] = lin_params(c_in, c_out)
        for et in edge_types:
            kname = "__".join(et)
            ls[kname] = jax.random.normal(next(keys), (num_heads, d), jnp.float32) / jnp.sqrt(d)
            ld[kname] = jax.random.normal(next(keys), (num_heads, d), jnp.float32) / jnp.sqrt(d)
        kw, kb = lin_params(c_out, c_out)
        q = jax.random.normal(next(keys), (c_out,), jnp.float32) / jnp.sqrt(c_out)
        return dict(proj_w=pw, proj_b=pb, lin_src=ls, lin_dst=ld, k_w=kw, k_b=kb, q=q)

    params = {"pre_w": {}, "pre_b": {}}
    for nt in node_types:
        params["pre_w"][nt], params["pre_b"][nt] = lin_params(in_dim[nt], hidden_dim)
    params["conv0"] = hanconv_params(hidden_dim, hidden_dim)
    params["conv1"] = hanconv_params(hidden_dim, hidden_dim)
    params["readout_w"], params["readout_b"] = lin_params(hidden_dim, out_dim)

    # deterministic node features
    x_dict = {nt: jax.random.normal(next(keys), (num_nodes[nt], in_dim[nt]), jnp.float32)
              for nt in node_types}

    # deterministic edge indices (PyG convention: [2, E], row0=src, row1=dst), no duplicates
    w_src = [a for a in range(8) for _ in range(3)]
    w_dst = [(a * 3 + k) % 16 for a in range(8) for k in range(3)]
    c_src = [q_ for q_ in range(16) for _ in range(2)]
    c_dst = [(q_ * 5 + 1 + k) % 16 for q_ in range(16) for k in range(2)]
    r_src = [q_ for q_ in range(16) for _ in range(2)]
    r_dst = [(q_ * 2 + k) % 8 for q_ in range(16) for k in range(2)]
    edge_index_dict = {
        edge_types[0]: jnp.array([w_src, w_dst], dtype=jnp.int32),
        edge_types[1]: jnp.array([c_src, c_dst], dtype=jnp.int32),
        edge_types[2]: jnp.array([r_src, r_dst], dtype=jnp.int32),
    }

    # Edge structure -> additive bias + gate, built once per graph, reused by both layers.
    bias_pad, gate_pad = build_edge_bias(edge_index_dict, edge_types, num_nodes)
    bias_pad = jax.block_until_ready(bias_pad)

    fwd = jax.jit(lambda prm, xd, bp, gp: hgraph_nn_forward(
        prm, xd, bp, gp, node_types, edge_types, target, num_heads))

    out = fwd(params, x_dict, bias_pad, gate_pad)
    out = jax.block_until_ready(out)
    assert out.shape == (num_nodes[target], out_dim), out.shape
    assert bool(jnp.all(jnp.isfinite(out)))
    print("KERNEL_OK")
</pallas_src>

<mosaic_0001>
module attributes {stable_mosaic.version = 11 : i64} {
  func.func @_prologue_pre_kernel(%arg0: i32, %arg1: memref<16x12xf32, #tpu.memory_space<vmem>>, %arg2: memref<12x32xf32, #tpu.memory_space<vmem>>, %arg3: memref<1x32xf32, #tpu.memory_space<vmem>>, %arg4: memref<32x32xf32, #tpu.memory_space<vmem>>, %arg5: memref<1x32xf32, #tpu.memory_space<vmem>>, %arg6: memref<32x4xf32, #tpu.memory_space<vmem>>, %arg7: memref<16x32xf32, #tpu.memory_space<vmem>>, %arg8: memref<16x4xf32, #tpu.memory_space<vmem>>) attributes {dimension_semantics = [#tpu.dimension_semantics<parallel>], iteration_bounds = array<i64: 1>, scalar_prefetch = 0 : i64, scratch_operands = 0 : i64, tpu.core_type = #tpu.core_type<tc>, window_params = [{transform_indices = @transform_0, window_bounds = array<i64: 16, 12>}, {pipeline_mode = #tpu.pipeline_mode<synchronous>, transform_indices = @transform_1, window_bounds = array<i64: 12, 32>}, {pipeline_mode = #tpu.pipeline_mode<synchronous>, transform_indices = @transform_2, window_bounds = array<i64: 1, 32>}, {pipeline_mode = #tpu.pipeline_mode<synchronous>, transform_indices = @transform_3, window_bounds = array<i64: 32, 32>}, {pipeline_mode = #tpu.pipeline_mode<synchronous>, transform_indices = @transform_4, window_bounds = array<i64: 1, 32>}, {pipeline_mode = #tpu.pipeline_mode<synchronous>, transform_indices = @transform_5, window_bounds = array<i64: 32, 4>}, {transform_indices = @transform_6, window_bounds = array<i64: 16, 32>}, {transform_indices = @transform_7, window_bounds = array<i64: 16, 4>}]} {
    %c0 = arith.constant 0 : index
    %c0_0 = arith.constant 0 : index
    %0 = vector.load %arg1[%c0, %c0_0] : memref<16x12xf32, #tpu.memory_space<vmem>>, vector<16x12xf32>
    %c0_1 = arith.constant 0 : index
    %c0_2 = arith.constant 0 : index
    %1 = vector.load %arg2[%c0_1, %c0_2] : memref<12x32xf32, #tpu.memory_space<vmem>>, vector<12x32xf32>
    %cst = arith.constant dense<0.000000e+00> : vector<16x32xf32>
    %2 = tpu.matmul %0, %1, %cst {dimension_numbers = #tpu.dot_dimension_numbers<[1], [0], [0], [1], [0, 0, 1, 1], [], []>} : vector<16x12xf32>, vector<12x32xf32>, vector<16x32xf32> -> vector<16x32xf32>
    %c0_3 = arith.constant 0 : index
    %c0_4 = arith.constant 0 : index
    %3 = vector.load %arg3[%c0_3, %c0_4] : memref<1x32xf32, #tpu.memory_space<vmem>>, vector<1x32xf32>
    %4 = vector.broadcast %3 : vector<1x32xf32> to vector<16x32xf32>
    %5 = arith.addf %2, %4 : vector<16x32xf32>
    %cst_5 = arith.constant 0.000000e+00 : f32
    %6 = vector.broadcast %cst_5 : f32 to vector<16x32xf32>
    %7 = arith.maximumf %5, %6 : vector<16x32xf32>
    %c0_6 = arith.constant 0 : index
    %c0_7 = arith.constant 0 : index
    %8 = vector.load %arg4[%c0_6, %c0_7] : memref<32x32xf32, #tpu.memory_space<vmem>>, vector<32x32xf32>
    %cst_8 = arith.constant dense<0.000000e+00> : vector<16x32xf32>
    %9 = tpu.matmul %7, %8, %cst_8 {dimension_numbers = #tpu.dot_dimension_numbers<[1], [0], [0], [1], [0, 0, 1, 1], [], []>} : vector<16x32xf32>, vector<32x32xf32>, vector<16x32xf32> -> vector<16x32xf32>
    %c0_9 = arith.constant 0 : index
    %c0_10 = arith.constant 0 : index
    %10 = vector.load %arg5[%c0_9, %c0_10] : memref<1x32xf32, #tpu.memory_space<vmem>>, vector<1x32xf32>
    %11 = vector.broadcast %10 : vector<1x32xf32> to vector<16x32xf32>
    %12 = arith.addf %9, %11 : vector<16x32xf32>
    %c0_11 = arith.constant 0 : index
    %c0_12 = arith.constant 0 : index
    %13 = vector.load %arg7[%c0_11, %c0_12] : memref<16x32xf32, #tpu.memory_space<vmem>>, vector<16x32xf32>
    tpu.vector_store %arg7[%c0_11, %c0_12], %12 {strides = array<i32>} : memref<16x32xf32, #tpu.memory_space<vmem>>, vector<16x32xf32>,
    %c0_13 = arith.constant 0 : index
    %c0_14 = arith.constant 0 : index
    %14 = vector.load %arg6[%c0_13, %c0_14] : memref<32x4xf32, #tpu.memory_space<vmem>>, vector<32x4xf32>
    %cst_15 = arith.constant dense<0.000000e+00> : vector<16x4xf32>
    %15 = tpu.matmul %12, %14, %cst_15 {dimension_numbers = #tpu.dot_dimension_numbers<[1], [0], [0], [1], [0, 0, 1, 1], [], []>} : vector<16x32xf32>, vector<32x4xf32>, vector<16x4xf32> -> vector<16x4xf32>
    %c0_16 = arith.constant 0 : index
    %c0_17 = arith.constant 0 : index
    %16 = vector.load %arg8[%c0_16, %c0_17] : memref<16x4xf32, #tpu.memory_space<vmem>>, vector<16x4xf32>
    tpu.vector_store %arg8[%c0_16, %c0_17], %15 {strides = array<i32>} : memref<16x4xf32, #tpu.memory_space<vmem>>, vector<16x4xf32>,
    return
  }
  func.func @transform_0(%arg0: i32) -> (i32, i32) {
    %c0_i32 = arith.constant 0 : i32
    %c0_i32_0 = arith.constant 0 : i32
    return %arg0, %c0_i32 : i32, i32
  }
  func.func @transform_1(%arg0: i32) -> (i32, i32) {
    %c0_i32 = arith.constant 0 : i32
    %c0_i32_0 = arith.constant 0 : i32
    %c0_i32_1 = arith.constant 0 : i32
    return %c0_i32, %c0_i32_0 : i32, i32
  }
  func.func @transform_2(%arg0: i32) -> (i32, i32) {
    %c0_i32 = arith.constant 0 : i32
    %c0_i32_0 = arith.constant 0 : i32
    %c0_i32_1 = arith.constant 0 : i32
    return %c0_i32, %c0_i32_0 : i32, i32
  }
  func.func @transform_3(%arg0: i32) -> (i32, i32) {
    %c0_i32 = arith.constant 0 : i32
    %c0_i32_0 = arith.constant 0 : i32
    %c0_i32_1 = arith.constant 0 : i32
    return %c0_i32, %c0_i32_0 : i32, i32
  }
  func.func @transform_4(%arg0: i32) -> (i32, i32) {
    %c0_i32 = arith.constant 0 : i32
    %c0_i32_0 = arith.constant 0 : i32
    %c0_i32_1 = arith.constant 0 : i32
    return %c0_i32, %c0_i32_0 : i32, i32
  }
  func.func @transform_5(%arg0: i32) -> (i32, i32) {
    %c0_i32 = arith.constant 0 : i32
    %c0_i32_0 = arith.constant 0 : i32
    %c0_i32_1 = arith.constant 0 : i32
    return %c0_i32, %c0_i32_0 : i32, i32
  }
  func.func @transform_6(%arg0: i32) -> (i32, i32) {
    %c0_i32 = arith.constant 0 : i32
    %c0_i32_0 = arith.constant 0 : i32
    return %arg0, %c0_i32 : i32, i32
  }
  func.func @transform_7(%arg0: i32) -> (i32, i32) {
    %c0_i32 = arith.constant 0 : i32
    %c0_i32_0 = arith.constant 0 : i32
    return %arg0, %c0_i32 : i32, i32
  }
}

module attributes {stable_mosaic.version = 11 : i64} {
  func.func @_prologue_pre_kernel(%arg0: i32, %arg1: memref<8x6xf32, #tpu.memory_space<vmem>>, %arg2: memref<6x32xf32, #tpu.memory_space<vmem>>, %arg3: memref<1x32xf32, #tpu.memory_space<vmem>>, %arg4: memref<32x32xf32, #tpu.memory_space<vmem>>, %arg5: memref<1x32xf32, #tpu.memory_space<vmem>>, %arg6: memref<32x2xf32, #tpu.memory_space<vmem>>, %arg7: memref<8x32xf32, #tpu.memory_space<vmem>>, %arg8: memref<8x2xf32, #tpu.memory_space<vmem>>) attributes {dimension_semantics = [#tpu.dimension_semantics<parallel>], iteration_bounds = array<i64: 1>, scalar_prefetch = 0 : i64, scratch_operands = 0 : i64, tpu.core_type = #tpu.core_type<tc>, window_params = [{transform_indices = @transform_0, window_bounds = array<i64: 8, 6>}, {pipeline_mode = #tpu.pipeline_mode<synchronous>, transform_indices = @transform_1, window_bounds = array<i64: 6, 32>}, {pipeline_mode = #tpu.pipeline_mode<synchronous>, transform_indices = @transform_2, window_bounds = array<i64: 1, 32>}, {pipeline_mode = #tpu.pipeline_mode<synchronous>, transform_indices = @transform_3, window_bounds = array<i64: 32, 32>}, {pipeline_mode = #tpu.pipeline_mode<synchronous>, transform_indices = @transform_4, window_bounds = array<i64: 1, 32>}, {pipeline_mode = #tpu.pipeline_mode<synchronous>, transform_indices = @transform_5, window_bounds = array<i64: 32, 2>}, {transform_indices = @transform_6, window_bounds = array<i64: 8, 32>}, {transform_indices = @transform_7, window_bounds = array<i64: 8, 2>}]} {
    %c0 = arith.constant 0 : index
    %c0_0 = arith.constant 0 : index
    %0 = vector.load %arg1[%c0, %c0_0] : memref<8x6xf32, #tpu.memory_space<vmem>>, vector<8x6xf32>
    %c0_1 = arith.constant 0 : index
    %c0_2 = arith.constant 0 : index
    %1 = vector.load %arg2[%c0_1, %c0_2] : memref<6x32xf32, #tpu.memory_space<vmem>>, vector<6x32xf32>
    %cst = arith.constant dense<0.000000e+00> : vector<8x32xf32>
    %2 = tpu.matmul %0, %1, %cst {dimension_numbers = #tpu.dot_dimension_numbers<[1], [0], [0], [1], [0, 0, 1, 1], [], []>} : vector<8x6xf32>, vector<6x32xf32>, vector<8x32xf32> -> vector<8x32xf32>
    %c0_3 = arith.constant 0 : index
    %c0_4 = arith.constant 0 : index
    %3 = vector.load %arg3[%c0_3, %c0_4] : memref<1x32xf32, #tpu.memory_space<vmem>>, vector<1x32xf32>
    %4 = vector.broadcast %3 : vector<1x32xf32> to vector<8x32xf32>
    %5 = arith.addf %2, %4 : vector<8x32xf32>
    %cst_5 = arith.constant 0.000000e+00 : f32
    %6 = vector.broadcast %cst_5 : f32 to vector<8x32xf32>
    %7 = arith.maximumf %5, %6 : vector<8x32xf32>
    %c0_6 = arith.constant 0 : index
    %c0_7 = arith.constant 0 : index
    %8 = vector.load %arg4[%c0_6, %c0_7] : memref<32x32xf32, #tpu.memory_space<vmem>>, vector<32x32xf32>
    %cst_8 = arith.constant dense<0.000000e+00> : vector<8x32xf32>
    %9 = tpu.matmul %7, %8, %cst_8 {dimension_numbers = #tpu.dot_dimension_numbers<[1], [0], [0], [1], [0, 0, 1, 1], [], []>} : vector<8x32xf32>, vector<32x32xf32>, vector<8x32xf32> -> vector<8x32xf32>
    %c0_9 = arith.constant 0 : index
    %c0_10 = arith.constant 0 : index
    %10 = vector.load %arg5[%c0_9, %c0_10] : memref<1x32xf32, #tpu.memory_space<vmem>>, vector<1x32xf32>
    %11 = vector.broadcast %10 : vector<1x32xf32> to vector<8x32xf32>
    %12 = arith.addf %9, %11 : vector<8x32xf32>
    %c0_11 = arith.constant 0 : index
    %c0_12 = arith.constant 0 : index
    %13 = vector.load %arg7[%c0_11, %c0_12] : memref<8x32xf32, #tpu.memory_space<vmem>>, vector<8x32xf32>
    tpu.vector_store %arg7[%c0_11, %c0_12], %12 {strides = array<i32>} : memref<8x32xf32, #tpu.memory_space<vmem>>, vector<8x32xf32>,
    %c0_13 = arith.constant 0 : index
    %c0_14 = arith.constant 0 : index
    %14 = vector.load %arg6[%c0_13, %c0_14] : memref<32x2xf32, #tpu.memory_space<vmem>>, vector<32x2xf32>
    %cst_15 = arith.constant dense<0.000000e+00> : vector<8x2xf32>
    %15 = tpu.matmul %12, %14, %cst_15 {dimension_numbers = #tpu.dot_dimension_numbers<[1], [0], [0], [1], [0, 0, 1, 1], [], []>} : vector<8x32xf32>, vector<32x2xf32>, vector<8x2xf32> -> vector<8x2xf32>
    %c0_16 = arith.constant 0 : index
    %c0_17 = arith.constant 0 : index
    %16 = vector.load %arg8[%c0_16, %c0_17] : memref<8x2xf32, #tpu.memory_space<vmem>>, vector<8x2xf32>
    tpu.vector_store %arg8[%c0_16, %c0_17], %15 {strides = array<i32>} : memref<8x2xf32, #tpu.memory_space<vmem>>, vector<8x2xf32>,
    return
  }
  func.func @transform_0(%arg0: i32) -> (i32, i32) {
    %c0_i32 = arith.constant 0 : i32
    %c0_i32_0 = arith.constant 0 : i32
    return %arg0, %c0_i32 : i32, i32
  }
  func.func @transform_1(%arg0: i32) -> (i32, i32) {
    %c0_i32 = arith.constant 0 : i32
    %c0_i32_0 = arith.constant 0 : i32
    %c0_i32_1 = arith.constant 0 : i32
    return %c0_i32, %c0_i32_0 : i32, i32
  }
  func.func @transform_2(%arg0: i32) -> (i32, i32) {
    %c0_i32 = arith.constant 0 : i32
    %c0_i32_0 = arith.constant 0 : i32
    %c0_i32_1 = arith.constant 0 : i32
    return %c0_i32, %c0_i32_0 : i32, i32
  }
  func.func @transform_3(%arg0: i32) -> (i32, i32) {
    %c0_i32 = arith.constant 0 : i32
    %c0_i32_0 = arith.constant 0 : i32
    %c0_i32_1 = arith.constant 0 : i32
    return %c0_i32, %c0_i32_0 : i32, i32
  }
  func.func @transform_4(%arg0: i32) -> (i32, i32) {
    %c0_i32 = arith.constant 0 : i32
    %c0_i32_0 = arith.constant 0 : i32
    %c0_i32_1 = arith.constant 0 : i32
    return %c0_i32, %c0_i32_0 : i32, i32
  }
  func.func @transform_5(%arg0: i32) -> (i32, i32) {
    %c0_i32 = arith.constant 0 : i32
    %c0_i32_0 = arith.constant 0 : i32
    %c0_i32_1 = arith.constant 0 : i32
    return %c0_i32, %c0_i32_0 : i32, i32
  }
  func.func @transform_6(%arg0: i32) -> (i32, i32) {
    %c0_i32 = arith.constant 0 : i32
    %c0_i32_0 = arith.constant 0 : i32
    return %arg0, %c0_i32 : i32, i32
  }
  func.func @transform_7(%arg0: i32) -> (i32, i32) {
    %c0_i32 = arith.constant 0 : i32
    %c0_i32_0 = arith.constant 0 : i32
    return %arg0, %c0_i32 : i32, i32
  }
}

module attributes {stable_mosaic.version = 11 : i64} {
  func.func @_han_attn_kernel(%arg0: i32, %arg1: memref<1x16x32xf32, #tpu.memory_space<vmem>>, %arg2: memref<1x1x16xf32, #tpu.memory_space<vmem>>, %arg3: memref<1x16x1xf32, #tpu.memory_space<vmem>>, %arg4: memref<1x16x16xf32, #tpu.memory_space<vmem>>, %arg5: memref<1x16x1xf32, #tpu.memory_space<vmem>>, %arg6: memref<1x16x32xf32, #tpu.memory_space<vmem>>) attributes {dimension_semantics = [#tpu.dimension_semantics<parallel>], iteration_bounds = array<i64: 3>, scalar_prefetch = 0 : i64, scratch_operands = 0 : i64, tpu.core_type = #tpu.core_type<tc>, window_params = [{transform_indices = @transform_0, window_bounds = array<i64: 1, 16, 32>}, {transform_indices = @transform_1, window_bounds = array<i64: 1, 1, 16>}, {transform_indices = @transform_2, window_bounds = array<i64: 1, 16, 1>}, {transform_indices = @transform_3, window_bounds = array<i64: 1, 16, 16>}, {transform_indices = @transform_4, window_bounds = array<i64: 1, 16, 1>}, {transform_indices = @transform_5, window_bounds = array<i64: 1, 16, 32>}]} {
    %c0 = arith.constant 0 : index
    %c0_0 = arith.constant 0 : index
    %c0_1 = arith.constant 0 : index
    %0 = vector.load %arg1[%c0, %c0_0, %c0_1] : memref<1x16x32xf32, #tpu.memory_space<vmem>>, vector<1x16x32xf32>
    %1 = vector.shape_cast %0 : vector<1x16x32xf32> to vector<16x32xf32>
    %c0_2 = arith.constant 0 : index
    %c0_3 = arith.constant 0 : index
    %c0_4 = arith.constant 0 : index
    %2 = vector.load %arg2[%c0_2, %c0_3, %c0_4] : memref<1x1x16xf32, #tpu.memory_space<vmem>>, vector<1x1x16xf32>
    %3 = vector.shape_cast %2 : vector<1x1x16xf32> to vector<1x16xf32>
    %c0_5 = arith.constant 0 : index
    %c0_6 = arith.constant 0 : index
    %c0_7 = arith.constant 0 : index
    %4 = vector.load %arg3[%c0_5, %c0_6, %c0_7] : memref<1x16x1xf32, #tpu.memory_space<vmem>>, vector<1x16x1xf32>
    %5 = vector.shape_cast %4 : vector<1x16x1xf32> to vector<16x1xf32>
    %c0_8 = arith.constant 0 : index
    %c0_9 = arith.constant 0 : index
    %c0_10 = arith.constant 0 : index
    %6 = vector.load %arg4[%c0_8, %c0_9, %c0_10] : memref<1x16x16xf32, #tpu.memory_space<vmem>>, vector<1x16x16xf32>
    %7 = vector.shape_cast %6 : vector<1x16x16xf32> to vector<16x16xf32>
    %c0_11 = arith.constant 0 : index
    %c0_12 = arith.constant 0 : index
    %c0_13 = arith.constant 0 : index
    %8 = vector.load %arg5[%c0_11, %c0_12, %c0_13] : memref<1x16x1xf32, #tpu.memory_space<vmem>>, vector<1x16x1xf32>
    %9 = vector.shape_cast %8 : vector<1x16x1xf32> to vector<16x1xf32>
    %10 = vector.broadcast %5 : vector<16x1xf32> to vector<16x16xf32>
    %11 = vector.broadcast %3 : vector<1x16xf32> to vector<16x16xf32>
    %12 = arith.addf %10, %11 : vector<16x16xf32>
    %cst = arith.constant 2.000000e-01 : f32
    %13 = vector.broadcast %cst : f32 to vector<16x16xf32>
    %14 = arith.mulf %13, %12 : vector<16x16xf32>
    %15 = arith.maximumf %12, %14 : vector<16x16xf32>
    %16 = arith.addf %15, %7 : vector<16x16xf32>
    %cst_14 = arith.constant dense<0xFF800000> : vector<16xf32>
    %17 = vector.multi_reduction <maximumf>, %16, %cst_14 [1] : vector<16x16xf32> to vector<16xf32>
    %18 = vector.shape_cast %17 : vector<16xf32> to vector<16x1xf32>
    %19 = vector.broadcast %18 : vector<16x1xf32> to vector<16x16xf32>
    %20 = arith.subf %16, %19 : vector<16x16xf32>
    %21 = math.exp %20 : vector<16x16xf32>
    %cst_15 = arith.constant dense<0.000000e+00> : vector<16xf32>
    %22 = vector.multi_reduction <add>, %21, %cst_15 [1] : vector<16x16xf32> to vector<16xf32>
    %23 = vector.shape_cast %22 : vector<16xf32> to vector<16x1xf32>
    %24 = tpu.reciprocal %23 {approx = true} : vector<16x1xf32> -> vector<16x1xf32>
    %25 = arith.mulf %24, %9 : vector<16x1xf32>
    %26 = vector.broadcast %25 : vector<16x1xf32> to vector<16x16xf32>
    %27 = arith.mulf %21, %26 : vector<16x16xf32>
    %cst_16 = arith.constant dense<0.000000e+00> : vector<16x32xf32>
    %28 = tpu.matmul %27, %1, %cst_16 {dimension_numbers = #tpu.dot_dimension_numbers<[1], [0], [0], [1], [0, 0, 1, 1], [], []>} : vector<16x16xf32>, vector<16x32xf32>, vector<16x32xf32> -> vector<16x32xf32>
    %cst_17 = arith.constant 0.000000e+00 : f32
    %29 = vector.broadcast %cst_17 : f32 to vector<16x32xf32>
    %30 = arith.maximumf %28, %29 : vector<16x32xf32>
    %c0_18 = arith.constant 0 : index
    %c0_19 = arith.constant 0 : index
    %c0_20 = arith.constant 0 : index
    %31 = vector.load %arg6[%c0_18, %c0_19, %c0_20] : memref<1x16x32xf32, #tpu.memory_space<vmem>>, vector<1x16x32xf32>
    %32 = vector.shape_cast %31 : vector<1x16x32xf32> to vector<16x32xf32>
    %33 = vector.shape_cast %30 : vector<16x32xf32> to vector<1x16x32xf32>
    tpu.vector_store %arg6[%c0_18, %c0_19, %c0_20], %33 {strides = array<i32>} : memref<1x16x32xf32, #tpu.memory_space<vmem>>, vector<1x16x32xf32>,
    return
  }
  func.func @transform_0(%arg0: i32) -> (i32, i32, i32) {
    %c0_i32 = arith.constant 0 : i32
    %c0_i32_0 = arith.constant 0 : i32
    %c0_i32_1 = arith.constant 0 : i32
    return %arg0, %c0_i32, %c0_i32_0 : i32, i32, i32
  }
  func.func @transform_1(%arg0: i32) -> (i32, i32, i32) {
    %c0_i32 = arith.constant 0 : i32
    %c0_i32_0 = arith.constant 0 : i32
    %c0_i32_1 = arith.constant 0 : i32
    return %arg0, %c0_i32, %c0_i32_0 : i32, i32, i32
  }
  func.func @transform_2(%arg0: i32) -> (i32, i32, i32) {
    %c0_i32 = arith.constant 0 : i32
    %c0_i32_0 = arith.constant 0 : i32
    %c0_i32_1 = arith.constant 0 : i32
    return %arg0, %c0_i32, %c0_i32_0 : i32, i32, i32
  }
  func.func @transform_3(%arg0: i32) -> (i32, i32, i32) {
    %c0_i32 = arith.constant 0 : i32
    %c0_i32_0 = arith.constant 0 : i32
    %c0_i32_1 = arith.constant 0 : i32
    return %arg0, %c0_i32, %c0_i32_0 : i32, i32, i32
  }
  func.func @transform_4(%arg0: i32) -> (i32, i32, i32) {
    %c0_i32 = arith.constant 0 : i32
    %c0_i32_0 = arith.constant 0 : i32
    %c0_i32_1 = arith.constant 0 : i32
    return %arg0, %c0_i32, %c0_i32_0 : i32, i32, i32
  }
  func.func @transform_5(%arg0: i32) -> (i32, i32, i32) {
    %c0_i32 = arith.constant 0 : i32
    %c0_i32_0 = arith.constant 0 : i32
    %c0_i32_1 = arith.constant 0 : i32
    return %arg0, %c0_i32, %c0_i32_0 : i32, i32, i32
  }
}

module attributes {stable_mosaic.version = 11 : i64} {
  func.func @_semantic_kernel(%arg0: i32, %arg1: memref<32x32xf32, #tpu.memory_space<vmem>>, %arg2: memref<32x32xf32, #tpu.memory_space<vmem>>, %arg3: memref<1x32xf32, #tpu.memory_space<vmem>>, %arg4: memref<1x32xf32, #tpu.memory_space<vmem>>, %arg5: memref<16x32xf32, #tpu.memory_space<vmem>>) attributes {dimension_semantics = [#tpu.dimension_semantics<arbitrary>], iteration_bounds = array<i64: 1>, scalar_prefetch = 0 : i64, scratch_operands = 0 : i64, tpu.core_type = #tpu.core_type<tc>, window_params = [{pipeline_mode = #tpu.pipeline_mode<synchronous>, transform_indices = @transform_0, window_bounds = array<i64: 32, 32>}, {pipeline_mode = #tpu.pipeline_mode<synchronous>, transform_indices = @transform_1, window_bounds = array<i64: 32, 32>}, {pipeline_mode = #tpu.pipeline_mode<synchronous>, transform_indices = @transform_2, window_bounds = array<i64: 1, 32>}, {pipeline_mode = #tpu.pipeline_mode<synchronous>, transform_indices = @transform_3, window_bounds = array<i64: 1, 32>}, {pipeline_mode = #tpu.pipeline_mode<synchronous>, transform_indices = @transform_4, window_bounds = array<i64: 16, 32>}]} {
    %c0 = arith.constant 0 : index
    %c0_0 = arith.constant 0 : index
    %0 = vector.load %arg1[%c0, %c0_0] : memref<32x32xf32, #tpu.memory_space<vmem>>, vector<32x32xf32>
    %c0_1 = arith.constant 0 : index
    %c0_2 = arith.constant 0 : index
    %1 = vector.load %arg2[%c0_1, %c0_2] : memref<32x32xf32, #tpu.memory_space<vmem>>, vector<32x32xf32>
    %cst = arith.constant dense<0.000000e+00> : vector<32x32xf32>
    %2 = tpu.matmul %0, %1, %cst {dimension_numbers = #tpu.dot_dimension_numbers<[1], [0], [0], [1], [0, 0, 1, 1], [], []>} : vector<32x32xf32>, vector<32x32xf32>, vector<32x32xf32> -> vector<32x32xf32>
    %c0_3 = arith.constant 0 : index
    %c0_4 = arith.constant 0 : index
    %3 = vector.load %arg3[%c0_3, %c0_4] : memref<1x32xf32, #tpu.memory_space<vmem>>, vector<1x32xf32>
    %4 = vector.broadcast %3 : vector<1x32xf32> to vector<32x32xf32>
    %5 = arith.addf %2, %4 : vector<32x32xf32>
    %6 = math.tanh %5 : vector<32x32xf32>
    %c0_5 = arith.constant 0 : index
    %c0_6 = arith.constant 0 : index
    %7 = vector.load %arg4[%c0_5, %c0_6] : memref<1x32xf32, #tpu.memory_space<vmem>>, vector<1x32xf32>
    %8 = vector.broadcast %7 : vector<1x32xf32> to vector<32x32xf32>
    %9 = arith.mulf %6, %8 : vector<32x32xf32>
    %cst_7 = arith.constant dense<0.000000e+00> : vector<32xf32>
    %10 = vector.multi_reduction <add>, %9, %cst_7 [1] : vector<32x32xf32> to vector<32xf32>
    %11 = vector.shape_cast %10 : vector<32xf32> to vector<32x1xf32>
    %12 = vector.extract_strided_slice %11 {offsets = [0, 0], sizes = [16, 1], strides = [1, 1]} : vector<32x1xf32> to vector<16x1xf32>
    %cst_8 = arith.constant dense<0.000000e+00> : vector<1xf32>
    %13 = vector.multi_reduction <add>, %12, %cst_8 [0] : vector<16x1xf32> to vector<1xf32>
    %14 = vector.shape_cast %13 : vector<1xf32> to vector<1x1xf32>
    %cst_9 = arith.constant 1.600000e+01 : f32
    %15 = vector.broadcast %cst_9 : f32 to vector<1x1xf32>
    %16 = arith.divf %14, %15 : vector<1x1xf32>
    %17 = vector.extract_strided_slice %11 {offsets = [16, 0], sizes = [16, 1], strides = [1, 1]} : vector<32x1xf32> to vector<16x1xf32>
    %cst_10 = arith.constant dense<0.000000e+00> : vector<1xf32>
    %18 = vector.multi_reduction <add>, %17, %cst_10 [0] : vector<16x1xf32> to vector<1xf32>
    %19 = vector.shape_cast %18 : vector<1xf32> to vector<1x1xf32>
    %cst_11 = arith.constant 1.600000e+01 : f32
    %20 = vector.broadcast %cst_11 : f32 to vector<1x1xf32>
    %21 = arith.divf %19, %20 : vector<1x1xf32>
    %22 = arith.maximumf %16, %21 : vector<1x1xf32>
    %23 = arith.subf %16, %22 : vector<1x1xf32>
    %24 = math.exp %23 : vector<1x1xf32>
    %25 = arith.subf %21, %22 : vector<1x1xf32>
    %26 = math.exp %25 : vector<1x1xf32>
    %27 = arith.addf %24, %26 : vector<1x1xf32>
    %28 = tpu.reciprocal %27 {approx = true} : vector<1x1xf32> -> vector<1x1xf32>
    %29 = arith.mulf %24, %28 : vector<1x1xf32>
    %30 = vector.extract_strided_slice %0 {offsets = [0, 0], sizes = [16, 32], strides = [1, 1]} : vector<32x32xf32> to vector<16x32xf32>
    %31 = vector.broadcast %29 : vector<1x1xf32> to vector<16x32xf32>
    %32 = arith.mulf %31, %30 : vector<16x32xf32>
    %33 = arith.mulf %26, %28 : vector<1x1xf32>
    %34 = vector.extract_strided_slice %0 {offsets = [16, 0], sizes = [16, 32], strides = [1, 1]} : vector<32x32xf32> to vector<16x32xf32>
    %35 = vector.broadcast %33 : vector<1x1xf32> to vector<16x32xf32>
    %36 = arith.mulf %35, %34 : vector<16x32xf32>
    %37 = arith.addf %32, %36 : vector<16x32xf32>
    %c0_12 = arith.constant 0 : index
    %c0_13 = arith.constant 0 : index
    %38 = vector.load %arg5[%c0_12, %c0_13] : memref<16x32xf32, #tpu.memory_space<vmem>>, vector<16x32xf32>
    tpu.vector_store %arg5[%c0_12, %c0_13], %37 {strides = array<i32>} : memref<16x32xf32, #tpu.memory_space<vmem>>, vector<16x32xf32>,
    return
  }
  func.func @transform_0(%arg0: i32) -> (i32, i32) {
    %c0_i32 = arith.constant 0 : i32
    %c0_i32_0 = arith.constant 0 : i32
    %c0_i32_1 = arith.constant 0 : i32
    return %c0_i32, %c0_i32_0 : i32, i32
  }
  func.func @transform_1(%arg0: i32) -> (i32, i32) {
    %c0_i32 = arith.constant 0 : i32
    %c0_i32_0 = arith.constant 0 : i32
    %c0_i32_1 = arith.constant 0 : i32
    return %c0_i32, %c0_i32_0 : i32, i32
  }
  func.func @transform_2(%arg0: i32) -> (i32, i32) {
    %c0_i32 = arith.constant 0 : i32
    %c0_i32_0 = arith.constant 0 : i32
    %c0_i32_1 = arith.constant 0 : i32
    return %c0_i32, %c0_i32_0 : i32, i32
  }
  func.func @transform_3(%arg0: i32) -> (i32, i32) {
    %c0_i32 = arith.constant 0 : i32
    %c0_i32_0 = arith.constant 0 : i32
    %c0_i32_1 = arith.constant 0 : i32
    return %c0_i32, %c0_i32_0 : i32, i32
  }
  func.func @transform_4(%arg0: i32) -> (i32, i32) {
    %c0_i32 = arith.constant 0 : i32
    %c0_i32_0 = arith.constant 0 : i32
    %c0_i32_1 = arith.constant 0 : i32
    return %c0_i32, %c0_i32_0 : i32, i32
  }
}

module attributes {stable_mosaic.version = 11 : i64} {
  func.func @_prologue_kernel(%arg0: i32, %arg1: memref<8x32xf32, #tpu.memory_space<vmem>>, %arg2: memref<32x32xf32, #tpu.memory_space<vmem>>, %arg3: memref<1x32xf32, #tpu.memory_space<vmem>>, %arg4: memref<32x2xf32, #tpu.memory_space<vmem>>, %arg5: memref<8x32xf32, #tpu.memory_space<vmem>>, %arg6: memref<8x2xf32, #tpu.memory_space<vmem>>) attributes {dimension_semantics = [#tpu.dimension_semantics<parallel>], iteration_bounds = array<i64: 1>, scalar_prefetch = 0 : i64, scratch_operands = 0 : i64, tpu.core_type = #tpu.core_type<tc>, window_params = [{transform_indices = @transform_0, window_bounds = array<i64: 8, 32>}, {pipeline_mode = #tpu.pipeline_mode<synchronous>, transform_indices = @transform_1, window_bounds = array<i64: 32, 32>}, {pipeline_mode = #tpu.pipeline_mode<synchronous>, transform_indices = @transform_2, window_bounds = array<i64: 1, 32>}, {pipeline_mode = #tpu.pipeline_mode<synchronous>, transform_indices = @transform_3, window_bounds = array<i64: 32, 2>}, {transform_indices = @transform_4, window_bounds = array<i64: 8, 32>}, {transform_indices = @transform_5, window_bounds = array<i64: 8, 2>}]} {
    %c0 = arith.constant 0 : index
    %c0_0 = arith.constant 0 : index
    %0 = vector.load %arg1[%c0, %c0_0] : memref<8x32xf32, #tpu.memory_space<vmem>>, vector<8x32xf32>
    %cst = arith.constant 0.000000e+00 : f32
    %1 = vector.broadcast %cst : f32 to vector<8x32xf32>
    %2 = arith.maximumf %0, %1 : vector<8x32xf32>
    %c0_1 = arith.constant 0 : index
    %c0_2 = arith.constant 0 : index
    %3 = vector.load %arg2[%c0_1, %c0_2] : memref<32x32xf32, #tpu.memory_space<vmem>>, vector<32x32xf32>
    %cst_3 = arith.constant dense<0.000000e+00> : vector<8x32xf32>
    %4 = tpu.matmul %2, %3, %cst_3 {dimension_numbers = #tpu.dot_dimension_numbers<[1], [0], [0], [1], [0, 0, 1, 1], [], []>} : vector<8x32xf32>, vector<32x32xf32>, vector<8x32xf32> -> vector<8x32xf32>
    %c0_4 = arith.constant 0 : index
    %c0_5 = arith.constant 0 : index
    %5 = vector.load %arg3[%c0_4, %c0_5] : memref<1x32xf32, #tpu.memory_space<vmem>>, vector<1x32xf32>
    %6 = vector.broadcast %5 : vector<1x32xf32> to vector<8x32xf32>
    %7 = arith.addf %4, %6 : vector<8x32xf32>
    %c0_6 = arith.constant 0 : index
    %c0_7 = arith.constant 0 : index
    %8 = vector.load %arg5[%c0_6, %c0_7] : memref<8x32xf32, #tpu.memory_space<vmem>>, vector<8x32xf32>
    tpu.vector_store %arg5[%c0_6, %c0_7], %7 {strides = array<i32>} : memref<8x32xf32, #tpu.memory_space<vmem>>, vector<8x32xf32>,
    %c0_8 = arith.constant 0 : index
    %c0_9 = arith.constant 0 : index
    %9 = vector.load %arg4[%c0_8, %c0_9] : memref<32x2xf32, #tpu.memory_space<vmem>>, vector<32x2xf32>
    %cst_10 = arith.constant dense<0.000000e+00> : vector<8x2xf32>
    %10 = tpu.matmul %7, %9, %cst_10 {dimension_numbers = #tpu.dot_dimension_numbers<[1], [0], [0], [1], [0, 0, 1, 1], [], []>} : vector<8x32xf32>, vector<32x2xf32>, vector<8x2xf32> -> vector<8x2xf32>
    %c0_11 = arith.constant 0 : index
    %c0_12 = arith.constant 0 : index
    %11 = vector.load %arg6[%c0_11, %c0_12] : memref<8x2xf32, #tpu.memory_space<vmem>>, vector<8x2xf32>
    tpu.vector_store %arg6[%c0_11, %c0_12], %10 {strides = array<i32>} : memref<8x2xf32, #tpu.memory_space<vmem>>, vector<8x2xf32>,
    return
  }
  func.func @transform_0(%arg0: i32) -> (i32, i32) {
    %c0_i32 = arith.constant 0 : i32
    %c0_i32_0 = arith.constant 0 : i32
    return %arg0, %c0_i32 : i32, i32
  }
  func.func @transform_1(%arg0: i32) -> (i32, i32) {
    %c0_i32 = arith.constant 0 : i32
    %c0_i32_0 = arith.constant 0 : i32
    %c0_i32_1 = arith.constant 0 : i32
    return %c0_i32, %c0_i32_0 : i32, i32
  }
  func.func @transform_2(%arg0: i32) -> (i32, i32) {
    %c0_i32 = arith.constant 0 : i32
    %c0_i32_0 = arith.constant 0 : i32
    %c0_i32_1 = arith.constant 0 : i32
    return %c0_i32, %c0_i32_0 : i32, i32
  }
  func.func @transform_3(%arg0: i32) -> (i32, i32) {
    %c0_i32 = arith.constant 0 : i32
    %c0_i32_0 = arith.constant 0 : i32
    %c0_i32_1 = arith.constant 0 : i32
    return %c0_i32, %c0_i32_0 : i32, i32
  }
  func.func @transform_4(%arg0: i32) -> (i32, i32) {
    %c0_i32 = arith.constant 0 : i32
    %c0_i32_0 = arith.constant 0 : i32
    return %arg0, %c0_i32 : i32, i32
  }
  func.func @transform_5(%arg0: i32) -> (i32, i32) {
    %c0_i32 = arith.constant 0 : i32
    %c0_i32_0 = arith.constant 0 : i32
    return %arg0, %c0_i32 : i32, i32
  }
}

module attributes {stable_mosaic.version = 11 : i64} {
  func.func @_prologue_kernel(%arg0: i32, %arg1: memref<16x32xf32, #tpu.memory_space<vmem>>, %arg2: memref<32x32xf32, #tpu.memory_space<vmem>>, %arg3: memref<1x32xf32, #tpu.memory_space<vmem>>, %arg4: memref<32x4xf32, #tpu.memory_space<vmem>>, %arg5: memref<16x32xf32, #tpu.memory_space<vmem>>, %arg6: memref<16x4xf32, #tpu.memory_space<vmem>>) attributes {dimension_semantics = [#tpu.dimension_semantics<parallel>], iteration_bounds = array<i64: 1>, scalar_prefetch = 0 : i64, scratch_operands = 0 : i64, tpu.core_type = #tpu.core_type<tc>, window_params = [{transform_indices = @transform_0, window_bounds = array<i64: 16, 32>}, {pipeline_mode = #tpu.pipeline_mode<synchronous>, transform_indices = @transform_1, window_bounds = array<i64: 32, 32>}, {pipeline_mode = #tpu.pipeline_mode<synchronous>, transform_indices = @transform_2, window_bounds = array<i64: 1, 32>}, {pipeline_mode = #tpu.pipeline_mode<synchronous>, transform_indices = @transform_3, window_bounds = array<i64: 32, 4>}, {transform_indices = @transform_4, window_bounds = array<i64: 16, 32>}, {transform_indices = @transform_5, window_bounds = array<i64: 16, 4>}]} {
    %c0 = arith.constant 0 : index
    %c0_0 = arith.constant 0 : index
    %0 = vector.load %arg1[%c0, %c0_0] : memref<16x32xf32, #tpu.memory_space<vmem>>, vector<16x32xf32>
    %cst = arith.constant 0.000000e+00 : f32
    %1 = vector.broadcast %cst : f32 to vector<16x32xf32>
    %2 = arith.maximumf %0, %1 : vector<16x32xf32>
    %c0_1 = arith.constant 0 : index
    %c0_2 = arith.constant 0 : index
    %3 = vector.load %arg2[%c0_1, %c0_2] : memref<32x32xf32, #tpu.memory_space<vmem>>, vector<32x32xf32>
    %cst_3 = arith.constant dense<0.000000e+00> : vector<16x32xf32>
    %4 = tpu.matmul %2, %3, %cst_3 {dimension_numbers = #tpu.dot_dimension_numbers<[1], [0], [0], [1], [0, 0, 1, 1], [], []>} : vector<16x32xf32>, vector<32x32xf32>, vector<16x32xf32> -> vector<16x32xf32>
    %c0_4 = arith.constant 0 : index
    %c0_5 = arith.constant 0 : index
    %5 = vector.load %arg3[%c0_4, %c0_5] : memref<1x32xf32, #tpu.memory_space<vmem>>, vector<1x32xf32>
    %6 = vector.broadcast %5 : vector<1x32xf32> to vector<16x32xf32>
    %7 = arith.addf %4, %6 : vector<16x32xf32>
    %c0_6 = arith.constant 0 : index
    %c0_7 = arith.constant 0 : index
    %8 = vector.load %arg5[%c0_6, %c0_7] : memref<16x32xf32, #tpu.memory_space<vmem>>, vector<16x32xf32>
    tpu.vector_store %arg5[%c0_6, %c0_7], %7 {strides = array<i32>} : memref<16x32xf32, #tpu.memory_space<vmem>>, vector<16x32xf32>,
    %c0_8 = arith.constant 0 : index
    %c0_9 = arith.constant 0 : index
    %9 = vector.load %arg4[%c0_8, %c0_9] : memref<32x4xf32, #tpu.memory_space<vmem>>, vector<32x4xf32>
    %cst_10 = arith.constant dense<0.000000e+00> : vector<16x4xf32>
    %10 = tpu.matmul %7, %9, %cst_10 {dimension_numbers = #tpu.dot_dimension_numbers<[1], [0], [0], [1], [0, 0, 1, 1], [], []>} : vector<16x32xf32>, vector<32x4xf32>, vector<16x4xf32> -> vector<16x4xf32>
    %c0_11 = arith.constant 0 : index
    %c0_12 = arith.constant 0 : index
    %11 = vector.load %arg6[%c0_11, %c0_12] : memref<16x4xf32, #tpu.memory_space<vmem>>, vector<16x4xf32>
    tpu.vector_store %arg6[%c0_11, %c0_12], %10 {strides = array<i32>} : memref<16x4xf32, #tpu.memory_space<vmem>>, vector<16x4xf32>,
    return
  }
  func.func @transform_0(%arg0: i32) -> (i32, i32) {
    %c0_i32 = arith.constant 0 : i32
    %c0_i32_0 = arith.constant 0 : i32
    return %arg0, %c0_i32 : i32, i32
  }
  func.func @transform_1(%arg0: i32) -> (i32, i32) {
    %c0_i32 = arith.constant 0 : i32
    %c0_i32_0 = arith.constant 0 : i32
    %c0_i32_1 = arith.constant 0 : i32
    return %c0_i32, %c0_i32_0 : i32, i32
  }
  func.func @transform_2(%arg0: i32) -> (i32, i32) {
    %c0_i32 = arith.constant 0 : i32
    %c0_i32_0 = arith.constant 0 : i32
    %c0_i32_1 = arith.constant 0 : i32
    return %c0_i32, %c0_i32_0 : i32, i32
  }
  func.func @transform_3(%arg0: i32) -> (i32, i32) {
    %c0_i32 = arith.constant 0 : i32
    %c0_i32_0 = arith.constant 0 : i32
    %c0_i32_1 = arith.constant 0 : i32
    return %c0_i32, %c0_i32_0 : i32, i32
  }
  func.func @transform_4(%arg0: i32) -> (i32, i32) {
    %c0_i32 = arith.constant 0 : i32
    %c0_i32_0 = arith.constant 0 : i32
    return %arg0, %c0_i32 : i32, i32
  }
  func.func @transform_5(%arg0: i32) -> (i32, i32) {
    %c0_i32 = arith.constant 0 : i32
    %c0_i32_0 = arith.constant 0 : i32
    return %arg0, %c0_i32 : i32, i32
  }
}

module attributes {stable_mosaic.version = 11 : i64} {
  func.func @_linear_kernel(%arg0: i32, %arg1: memref<16x32xf32, #tpu.memory_space<vmem>>, %arg2: memref<32x8xf32, #tpu.memory_space<vmem>>, %arg3: memref<1x8xf32, #tpu.memory_space<vmem>>, %arg4: memref<16x8xf32, #tpu.memory_space<vmem>>) attributes {dimension_semantics = [#tpu.dimension_semantics<parallel>], iteration_bounds = array<i64: 1>, scalar_prefetch = 0 : i64, scratch_operands = 0 : i64, tpu.core_type = #tpu.core_type<tc>, window_params = [{transform_indices = @transform_0, window_bounds = array<i64: 16, 32>}, {pipeline_mode = #tpu.pipeline_mode<synchronous>, transform_indices = @transform_1, window_bounds = array<i64: 32, 8>}, {pipeline_mode = #tpu.pipeline_mode<synchronous>, transform_indices = @transform_2, window_bounds = array<i64: 1, 8>}, {transform_indices = @transform_3, window_bounds = array<i64: 16, 8>}]} {
    %c0 = arith.constant 0 : index
    %c0_0 = arith.constant 0 : index
    %0 = vector.load %arg1[%c0, %c0_0] : memref<16x32xf32, #tpu.memory_space<vmem>>, vector<16x32xf32>
    %c0_1 = arith.constant 0 : index
    %c0_2 = arith.constant 0 : index
    %1 = vector.load %arg2[%c0_1, %c0_2] : memref<32x8xf32, #tpu.memory_space<vmem>>, vector<32x8xf32>
    %cst = arith.constant dense<0.000000e+00> : vector<16x8xf32>
    %2 = tpu.matmul %0, %1, %cst {dimension_numbers = #tpu.dot_dimension_numbers<[1], [0], [0], [1], [0, 0, 1, 1], [], []>} : vector<16x32xf32>, vector<32x8xf32>, vector<16x8xf32> -> vector<16x8xf32>
    %c0_3 = arith.constant 0 : index
    %c0_4 = arith.constant 0 : index
    %3 = vector.load %arg3[%c0_3, %c0_4] : memref<1x8xf32, #tpu.memory_space<vmem>>, vector<1x8xf32>
    %4 = vector.broadcast %3 : vector<1x8xf32> to vector<16x8xf32>
    %5 = arith.addf %2, %4 : vector<16x8xf32>
    %c0_5 = arith.constant 0 : index
    %c0_6 = arith.constant 0 : index
    %6 = vector.load %arg4[%c0_5, %c0_6] : memref<16x8xf32, #tpu.memory_space<vmem>>, vector<16x8xf32>
    tpu.vector_store %arg4[%c0_5, %c0_6], %5 {strides = array<i32>} : memref<16x8xf32, #tpu.memory_space<vmem>>, vector<16x8xf32>,
    return
  }
  func.func @transform_0(%arg0: i32) -> (i32, i32) {
    %c0_i32 = arith.constant 0 : i32
    %c0_i32_0 = arith.constant 0 : i32
    return %arg0, %c0_i32 : i32, i32
  }
  func.func @transform_1(%arg0: i32) -> (i32, i32) {
    %c0_i32 = arith.constant 0 : i32
    %c0_i32_0 = arith.constant 0 : i32
    %c0_i32_1 = arith.constant 0 : i32
    return %c0_i32, %c0_i32_0 : i32, i32
  }
  func.func @transform_2(%arg0: i32) -> (i32, i32) {
    %c0_i32 = arith.constant 0 : i32
    %c0_i32_0 = arith.constant 0 : i32
    %c0_i32_1 = arith.constant 0 : i32
    return %c0_i32, %c0_i32_0 : i32, i32
  }
  func.func @transform_3(%arg0: i32) -> (i32, i32) {
    %c0_i32 = arith.constant 0 : i32
    %c0_i32_0 = arith.constant 0 : i32
    return %arg0, %c0_i32 : i32, i32
  }
}

</mosaic_0001>

<bundles_post_ra>
// kernel: _lambda_.10
= control target key start
LH: loop header
LB: loop body
LE: loop exit
PB: predicated region body
PF: predicated region fallthrough
CT: control target
= control target key end

     0   :  { %vm43_vm0 = vcmask 1043456   ;;  %vm36_vm1 = vcmask 97280   ;;  %vm135_vm2 = vcmask 261120   ;;  %vm304_vm3 = vcmask 31744   ;;  %s469_s1 = inlined_call_operand.vmem [shape: f32[12,32], index: 1, kind: input, shape index: {}]   ;;  %s470_s0 = inlined_call_operand.vmem [shape: f32[16,12], index: 0, kind: input, shape index: {}]   ;;  %s471_s3 = inlined_call_operand.vmem [shape: f32[32,32], index: 3, kind: input, shape index: {}]   ;;  %s472_s5 = inlined_call_operand.vmem [shape: f32[32,4], index: 5, kind: input, shape index: {}]   ;;  %s473_s2 = inlined_call_operand.vmem [shape: f32[1,32], index: 2, kind: input, shape index: {}]   ;;  %s474_s4 = inlined_call_operand.vmem [shape: f32[1,32], index: 4, kind: input, shape index: {}]   ;;  %s475_s6 = inlined_call_operand.vmem [shape: f32[16,32], index: 6, kind: output, shape index: {0}]   ;;  %s476_s7 = inlined_call_operand.vmem [shape: f32[16,4], index: 7, kind: output, shape index: {1}]  }
   0x1   :  { %v28_v0 = vld [vmem:[%s469_s1 + $0x8] sm:$0xf]  ;;  %v27_v1 = vld [vmem:[%s469_s1] sm:$0xff]  ;;  %v127_v4 = vld [vmem:[%s471_s3 + $0x18] sm:$0xff] }
   0x2   :  { %v25_v2 = vld [vmem:[%s470_s0] sm:$0xff]  ;;  %340 = vmatprep.subr.msk.mxu0 %vm43_vm0, %v28_v0  ;;  %v26_v3 = vld [vmem:[%s470_s0 + $0x8] sm:$0xff]  ;;  %347 = vmatprep.subr.mxu1 %v127_v4  ;;  %v126_v5 = vld [vmem:[%s471_s3 + $0x10] sm:$0xff] }
   0x3   :  { %344 = vmatprep.mubr.msk.f32.mxu0 %vm36_vm1, %v25_v2  ;;  %341 = vmatpush3.msk.msra.mxu0 %vm43_vm0, %v28_v0  ;;  %v125_v6 = vld [vmem:[%s471_s3 + $0x8] sm:$0xff]  ;;  %v124_v7 = vld [vmem:[%s471_s3] sm:$0xff]  ;;  %v222_v8 = vld [vmem:[%s472_s5 + $0x18] sm:$0xff] }
   0x4   :  { %342 = vmatprep.subr.mxu0 %v27_v1  ;;  %348 = vmatpush3.msra.mxu1 %v127_v4  ;;  %v315_v9 = vld [vmem:[%s473_s2] ss:$0 sm:$0xff]  ;;  %v221_v16 = vld [vmem:[%s472_s5 + $0x10] sm:$0xff]  ;;  %v220_v17 = vld [vmem:[%s472_s5 + $0x8] sm:$0xff] }
   0x5   :  { %343 = vmatpush3.msra.mxu0 %v27_v1  ;;  %349 = vmatprep.subr.mxu1 %v126_v5  ;;  %v219_v18 = vld [vmem:[%s472_s5] sm:$0xff] }
   0x6   :  { %345 = vmatmul.mubr.msk.f32.vlgmr.msra.gmra.mxu0 %vm36_vm1, %v26_v3  ;;  %350 = vmatpush3.msra.mxu1 %v126_v5  ;;  %v319_v19 = vld [vmem:[%s474_s4] ss:$0 sm:$0xff] }
   0x7   :  { %351 = vmatprep.subr.mxu1 %v125_v6  ;;  %358 = vmatprep.subr.mxu0 %v222_v8 }
   0x8   :  { %352 = vmatpush3.msra.mxu1 %v125_v6  ;;  %359 = vmatpush3.msra.mxu0 %v222_v8 }
   0x9   :  { %353 = vmatprep.subr.mxu1 %v124_v7  ;;  %360 = vmatprep.subr.mxu0 %v221_v16 }
   0xa   :  { %354 = vmatpush3.msra.mxu1 %v124_v7  ;;  %361 = vmatpush3.msra.mxu0 %v221_v16 }
   0xb   :  { %362 = vmatprep.subr.mxu0 %v220_v17 }
   0xc   :  { %363 = vmatpush3.msra.mxu0 %v220_v17 }
   0xd   :  { %364 = vmatprep.subr.mxu0 %v219_v18 }
   0xe   :  { %365 = vmatpush3.msra.mxu0 %v219_v18 }
  0xc6   :  { %v346_v10 = vpop.f32.mrf.mxu0 }
  0xc7   :  { %v119_v11 = vadd.f32 %v346_v10, %v315_v9 }
  0xc8   :  { %v113_v12 = vpop.f32.mrf.mxu0 }
  0xc9   :  { %v114_v13 = vadd.f32 %v315_v9, %v113_v12  ;;  %v123_v15 = vmax.f32 %v119_v11, 0.0 }
  0xcb   :  { %v122_v14 = vmax.f32 %v114_v13, 0.0 }
  0xcd   :  { %355 = vmatprep.mubr.msk.f32.mxu1 %vm135_vm2, %v122_v14 }
  0xce   :  { %356 = vmatmul.mubr.msk.f32.vlgmr.msra.gmra.mxu1 %vm135_vm2, %v123_v15 }
 0x18e   :  { %v357_v20 = vpop.f32.mrf.mxu1 }
 0x18f   :  { %v214_v21 = vadd.f32 %v357_v20, %v319_v19 }
 0x190   :  { %v208_v22 = vpop.f32.mrf.mxu1 }
 0x191   :  { %218 = vst.msk [vmem:[%s475_s6 + $0x8] sm:$0xff] %vm135_vm2, %v214_v21  ;;  %v209_v23 = vadd.f32 %v319_v19, %v208_v22 }
 0x193   :  { %217 = vst.msk [vmem:[%s475_s6] sm:$0xff] %vm135_vm2, %v209_v23  ;;  %366 = vmatprep.mubr.msk.f32.mxu0 %vm135_vm2, %v209_v23 }
 0x194   :  { %367 = vmatmul.mubr.msk.f32.vlgmr.msra.gmra.mxu0 %vm135_vm2, %v214_v21 }
 0x254   :  { %v368_v24 = vpop.f32.mrf.mxu0 }
 0x255   :  { %306 = vst.msk [vmem:[%s476_s7 + $0x8] sm:$0xff] %vm304_vm3, %v368_v24 }
 0x256   :  { %v295_v25 = vpop.f32.mrf.mxu0 }
 0x257   :  { %305 = vst.msk [vmem:[%s476_s7] sm:$0xff] %vm304_vm3, %v295_v25 }

// kernel: _lambda_.9
= control target key start
LH: loop header
LB: loop body
LE: loop exit
PB: predicated region body
PF: predicated region fallthrough
CT: control target
= control target key end

     0   :  { %vm38_vm0 = vcmask 1045504   ;;  %vm34_vm1 = vcmask 48128   ;;  %v333_v0 = vmov 0.0   ;;  %vm334_vm2 = vmmov 0   ;;  %s417_s1 = inlined_call_operand.vmem [shape: f32[6,32], index: 1, kind: input, shape index: {}]   ;;  %s418_s0 = inlined_call_operand.vmem [shape: f32[8,6], index: 0, kind: input, shape index: {}]   ;;  %s419_s3 = inlined_call_operand.vmem [shape: f32[32,32], index: 3, kind: input, shape index: {}]   ;;  %s420_s5 = inlined_call_operand.vmem [shape: f32[32,2], index: 5, kind: input, shape index: {}]   ;;  %s421_s2 = inlined_call_operand.vmem [shape: f32[1,32], index: 2, kind: input, shape index: {}]   ;;  %s422_s4 = inlined_call_operand.vmem [shape: f32[1,32], index: 4, kind: input, shape index: {}]   ;;  %s423_s6 = inlined_call_operand.vmem [shape: f32[8,32], index: 6, kind: output, shape index: {0}]   ;;  %s424_s7 = inlined_call_operand.vmem [shape: f32[8,2], index: 7, kind: output, shape index: {1}]  }
   0x1   :  { %304 = vmatprep.subr.mxu0 %v333_v0  ;;  %v26_v1 = vld [vmem:[%s417_s1] sm:$0x3f]  ;;  %306 = vmatprep.mubr.msk.f32.mxu0 %vm334_vm2, %v333_v0  ;;  %v116_v3 = vld [vmem:[%s419_s3 + $0x18] sm:$0xff]  ;;  %v115_v4 = vld [vmem:[%s419_s3 + $0x10] sm:$0xff]  ;;  %vm124_vm3 = vcmask 261120   ;;  %vm276_vm4 = vcmask 15360  }
   0x2   :  { %v25_v2 = vld [vmem:[%s418_s0] sm:$0xff]  ;;  %305 = vmatpush3.msk.msra.mxu0 %vm38_vm0, %v26_v1  ;;  %309 = vmatprep.subr.mxu1 %v333_v0  ;;  %v114_v5 = vld [vmem:[%s419_s3 + $0x8] sm:$0xff]  ;;  %v202_v7 = vld [vmem:[%s420_s5 + $0x18] sm:$0xff] }
   0x3   :  { %307 = vmatmul.mubr.msk.f32.vlgmr.msra.gmra.mxu0 %vm34_vm1, %v25_v2  ;;  %310 = vmatpush3.msra.mxu1 %v116_v3  ;;  %v113_v6 = vld [vmem:[%s419_s3] sm:$0xff]  ;;  %v201_v8 = vld [vmem:[%s420_s5 + $0x10] sm:$0xff]  ;;  %v200_v14 = vld [vmem:[%s420_s5 + $0x8] sm:$0xff] }
   0x4   :  { %311 = vmatprep.subr.mxu1 %v333_v0  ;;  %317 = vmatprep.mubr.msk.f32.mxu1 %vm334_vm2, %v333_v0  ;;  %v286_v9 = vld [vmem:[%s421_s2] ss:$0 sm:$0xff] }
   0x5   :  { %320 = vmatprep.subr.mxu0 %v333_v0  ;;  %328 = vmatprep.mubr.msk.f32.mxu0 %vm334_vm2, %v333_v0  ;;  %v199_v15 = vld [vmem:[%s420_s5] sm:$0xff] }
   0x6   :  { %312 = vmatpush3.msra.mxu1 %v115_v4  ;;  %321 = vmatpush3.msra.mxu0 %v202_v7  ;;  %v289_v16 = vld [vmem:[%s422_s4] ss:$0 sm:$0xff] }
   0x7   :  { %313 = vmatprep.subr.mxu1 %v333_v0  ;;  %322 = vmatprep.subr.mxu0 %v333_v0 }
   0x8   :  { %314 = vmatpush3.msra.mxu1 %v114_v5  ;;  %323 = vmatpush3.msra.mxu0 %v201_v8 }
   0x9   :  { %315 = vmatprep.subr.mxu1 %v333_v0  ;;  %324 = vmatprep.subr.mxu0 %v333_v0 }
   0xa   :  { %316 = vmatpush3.msra.mxu1 %v113_v6  ;;  %325 = vmatpush3.msra.mxu0 %v200_v14 }
   0xb   :  { %326 = vmatprep.subr.mxu0 %v333_v0 }
   0xc   :  { %327 = vmatpush3.msra.mxu0 %v199_v15 }
  0xc3   :  { %v108_v10 = vpop.f32.mrf.mxu0 }
  0xc4   :  { %v109_v11 = vadd.f32 %v286_v9, %v108_v10 }
  0xc5   :  { %v308_v12 = vpop.f32.mrf.mxu0 }
  0xc6   :  { %v112_v13 = vmax.f32 %v109_v11, 0.0 }
  0xc8   :  { %318 = vmatmul.mubr.msk.f32.vlgmr.msra.gmra.mxu1 %vm124_vm3, %v112_v13 }
 0x188   :  { %v194_v17 = vpop.f32.mrf.mxu1 }
 0x189   :  { %v195_v18 = vadd.f32 %v289_v16, %v194_v17 }
 0x18a   :  { %v319_v19 = vpop.f32.mrf.mxu1 }
 0x18b   :  { %198 = vst.msk [vmem:[%s423_s6] sm:$0xff] %vm124_vm3, %v195_v18  ;;  %329 = vmatmul.mubr.msk.f32.vlgmr.msra.gmra.mxu0 %vm124_vm3, %v195_v18 }
 0x24b   :  { %v272_v20 = vpop.f32.mrf.mxu0 }
 0x24c   :  { %277 = vst.msk [vmem:[%s424_s7] sm:$0xff] %vm276_vm4, %v272_v20 }
 0x24d   :  { %v330_v21 = vpop.f32.mrf.mxu0 }

// kernel: _lambda_.11
= control target key start
LH: loop header
LB: loop body
LE: loop exit
PB: predicated region body
PF: predicated region fallthrough
CT: control target
= control target key end

     0   :  { %s647_s18 = smov 0   ;;  %s689_s0 = inlined_call_operand.vmem [shape: f32[3,16,32], index: 0, kind: input, shape index: {}]   ;;  %s690_s1 = inlined_call_operand.vmem [shape: f32[3,1,16], index: 1, kind: input, shape index: {}]   ;;  %s691_s2 = inlined_call_operand.vmem [shape: f32[3,16,1], index: 2, kind: input, shape index: {}]   ;;  %s692_s3 = inlined_call_operand.vmem [shape: f32[3,16,16], index: 3, kind: input, shape index: {}]   ;;  %s693_s4 = inlined_call_operand.vmem [shape: f32[3,16,1], index: 4, kind: input, shape index: {}]   ;;  %s694_s5 = inlined_call_operand.vmem [shape: f32[3,16,32], index: 5, kind: output, shape index: {}]  }
   0x1 LB: > { %s553_s19 = sadd.s32 4294967295, %s614_s18   ;;  %p557_p0 = scmp.ge.s32.totalorder %s614_s18, 1  ;;  %s614_s18 = sphi %s647_s18, %s15_s18  }
   0x2   : > { %p225_p1 = scmp.lt.s32.totalorder %s614_s18, 4 }
   0x4   : > { %p226_p2 = pnand %p557_p0, %p225_p1 }
   0x5   : > { %p271_p3 = scmp.lt.s32.totalorder (!%p226_p2), %s553_s19, 2 }
   0x6   : > { %229 = sbr.rel (%p226_p2) target bundleno = 787 (0x313), region = 40 }
   0xb   : > { %v616_v0 = vmov 0   ;;  %s696_s19 = smov (!%p271_p3, %s553_s19), 2  ;;  %vm332_vm0 = vcmask 130048   ;;  %vm450_vm1 = vcmask 261120  }
   0xc   : > { %598 = vset.pattern.permute.xlu0 %v616_v0  ;;  %599 = vset.pattern.permute.xlu1 %v616_v0  ;;  %s655_s20 = sshll.u32 %s696_s19, 4  ;;  %s278_s26 = scalar_lea.vmem %s690_s1, %s696_s19 }
   0xd   : > { %s283_s23 = scalar_lea.vmem %s691_s2, %s655_s20  ;;  %v568_v3 = vld [vmem:[%s278_s26] ss:$0 sm:$0xff]  ;;  %s288_s29 = scalar_lea.vmem %s692_s3, %s655_s20 }
   0xe   : > { %v302_v1 = vld [vmem:[%s283_s23] sm:$0xff]  ;;  %v303_v2 = vld [vmem:[%s283_s23 + $0x8] sm:$0xff]  ;;  %s293_s7 = scalar_lea.vmem %s693_s4, %s655_s20  ;;  %s275_s10 = scalar_lea.vmem %s689_s0, %s655_s20 }
   0xf   : > { %310 = vperm.xlu0 %598, %v302_v1   ;;  %v304_v8 = vld [vmem:[%s288_s29] sm:$0xff]  ;;  %v305_v13 = vld [vmem:[%s288_s29 + $0x8] sm:$0xff]  ;;  %s298_s13 = scalar_lea.vmem %s694_s5, %s655_s20 }
  0x10   : > { %v306_v30 = vld [vmem:[%s293_s7] sm:$0xff]  ;;  %v300_v32 = vld [vmem:[%s275_s10 + $0x8] sm:$0xff] }
  0x11   : > { %582 = vmatprep.subr.mxu0 %v300_v32  ;;  %v307_v34 = vld [vmem:[%s293_s7 + $0x8] sm:$0xff]  ;;  %v299_v35 = vld [vmem:[%s275_s10] sm:$0xff] }
  0x12   : > { %583 = vmatpush3.msra.mxu0 %v300_v32 }
  0x13   : > { %315 = vperm.xlu0 %598, %v303_v2   ;;  %584 = vmatprep.subr.mxu0 %v299_v35 }
  0x14   : > { %585 = vmatpush3.msra.mxu0 %v299_v35 }
  0x8a   : > { %v311_v4 = vpop.permute.xlu0 %310 }
  0x8b   : > { %v324_v5 = vadd.f32 %v568_v3, %v311_v4 }
  0x8d   : > { %v326_v6 = vmul.f32 0.2, %v324_v5 }
  0x8e   : > { %v316_v7 = vpop.permute.xlu0 %315 }
  0x8f   : > { %v328_v9 = vmax.f32 %v324_v5, %v326_v6  ;;  %v325_v10 = vadd.f32 %v568_v3, %v316_v7 }
  0x91   : > { %v327_v11 = vmul.f32 0.2, %v325_v10  ;;  %v330_v12 = vadd.f32 %v328_v9, %v304_v8 }
  0x93   : > { %v329_v14 = vmax.f32 %v325_v10, %v327_v11  ;;  %v333_v15 = vsel %vm332_vm0, %v330_v12, -inf }
  0x94   : > { %334 = vmax.xlane.f32.xlu1 %v333_v15 }
  0x95   : > { %v331_v16 = vadd.f32 %v329_v14, %v305_v13 }
  0x97   : > { %v336_v17 = vsel %vm332_vm0, %v331_v16, -inf }
  0x98   : > { %337 = vmax.xlane.f32.xlu1 %v336_v17 }
 0x11d   : > { %v335_v18 = vpop.xlane.xlu1 %334 }
 0x11e   : > { %v339_v19 = vsub.f32 %v330_v12, %v335_v18 }
 0x120   : > { %v341_v20 = vmul.f32 1.442695, %v339_v19 }
 0x121   : > { %v338_v21 = vpop.xlane.xlu1 %337 }
 0x122   : > { %600 = vpow2.f32 %v341_v20  ;;  %v340_v22 = vsub.f32 %v331_v16, %v338_v21 }
 0x124   : > { %v343_v23 = vmul.f32 1.442695, %v340_v22 }
 0x126   : > { %602 = vpow2.f32 %v343_v23 }
 0x12f   : > { %v601_v24 = vpop.eup %600 }
 0x130   : > { %v345_v25 = vsel %vm332_vm0, %v601_v24, 0.0 }
 0x131   : > { %346 = vadd.xlane.f32.xlu0 %v345_v25 }
 0x133   : > { %v603_v26 = vpop.eup %602 }
 0x134   : > { %v348_v27 = vsel %vm332_vm0, %v603_v26, 0.0 }
 0x135   : > { %349 = vadd.xlane.f32.xlu1 %v348_v27 }
 0x1ba   : > { %v347_v28 = vpop.xlane.xlu0 %346 }
 0x1bb   : > { %604 = vrcp.f32 %v347_v28 }
 0x1be   : > { %v350_v29 = vpop.xlane.xlu1 %349 }
 0x1bf   : > { %606 = vrcp.f32 %v350_v29 }
 0x1c8   : > { %v605_v31 = vpop.eup %604 }
 0x1c9   : > { %v353_v33 = vmul.f32 %v605_v31, %v306_v30 }
 0x1cb   : > { %357 = vperm.xlu1 %599, %v353_v33  }
 0x1cc   : > { %v607_v36 = vpop.eup %606 }
 0x1cd   : > { %v354_v37 = vmul.f32 %v607_v36, %v307_v34 }
 0x1cf   : > { %362 = vperm.xlu1 %599, %v354_v37  }
 0x246   : > { %v358_v38 = vpop.permute.xlu1 %357 }
 0x247   : > { %v365_v39 = vmul.f32 %v601_v24, %v358_v38 }
 0x249   : > { %586 = vmatprep.mubr.msk.f32.mxu0 %vm332_vm0, %v365_v39 }
 0x24a   : > { %v363_v40 = vpop.permute.xlu1 %362 }
 0x24b   : > { %v366_v41 = vmul.f32 %v603_v26, %v363_v40 }
 0x24d   : > { %587 = vmatmul.mubr.msk.f32.vlgmr.msra.gmra.mxu0 %vm332_vm0, %v366_v41 }
 0x30d   : > { %v588_v42 = vpop.f32.mrf.mxu0 }
 0x30e   : > { %v449_v43 = vmax.f32 %v588_v42, 0.0 }
 0x30f   : > { %v439_v44 = vpop.f32.mrf.mxu0 }
 0x310   : > { %452 = vst.msk [vmem:[%s298_s13 + $0x8] sm:$0xff] %vm450_vm1, %v449_v43  ;;  %v448_v45 = vmax.f32 %v439_v44, 0.0 }
 0x312   : > { %451 = vst.msk [vmem:[%s298_s13] sm:$0xff] %vm450_vm1, %v448_v45 }
 0x313 PF: > { %s15_s18 = sadd.s32 1, %s614_s18  }
 0x314   : > { %p12_p4 = scmp.ge.s32.totalorder %s15_s18, 5  }
 0x316   :  { %14 = sbr.rel (!%p12_p4) target bundleno = 1 (0x1), region = 82 }

// kernel: _lambda_.12
= control target key start
LH: loop header
LB: loop body
LE: loop exit
PB: predicated region body
PF: predicated region fallthrough
CT: control target
= control target key end

     0   :  { %vm32_vm0 = vcmask 261120   ;;  %s334_s1 = inlined_call_operand.vmem [shape: f32[32,32], index: 1, kind: input, shape index: {}]   ;;  %s335_s0 = inlined_call_operand.vmem [shape: f32[32,32], index: 0, kind: input, shape index: {}]   ;;  %s336_s2 = inlined_call_operand.vmem [shape: f32[1,32], index: 2, kind: input, shape index: {}]   ;;  %s337_s3 = inlined_call_operand.vmem [shape: f32[1,32], index: 3, kind: input, shape index: {}]   ;;  %s338_s4 = inlined_call_operand.vmem [shape: f32[16,32], index: 4, kind: output, shape index: {}]  }
   0x1   :  { %v24_v0 = vld [vmem:[%s334_s1 + $0x18] sm:$0xff]  ;;  %v23_v1 = vld [vmem:[%s334_s1 + $0x10] sm:$0xff]  ;;  %v22_v2 = vld [vmem:[%s334_s1 + $0x8] sm:$0xff] }
   0x2   :  { %211 = vmatprep.subr.mxu0 %v24_v0  ;;  %225 = vmatprep.subr.mxu1 %v24_v0  ;;  %v21_v3 = vld [vmem:[%s334_s1] sm:$0xff]  ;;  %v292_v5 = vld [vmem:[%s335_s0 + $0x10] sm:$0xff]  ;;  %v297_v6 = vld [vmem:[%s335_s0 + $0x8] sm:$0xff] }
   0x3   :  { %212 = vmatpush3.msra.mxu0 %v24_v0  ;;  %229 = vmatpush3.msra.mxu1 %v24_v0  ;;  %v287_v4 = vld [vmem:[%s335_s0] sm:$0xff]  ;;  %v302_v7 = vld [vmem:[%s335_s0 + $0x18] sm:$0xff] }
   0x4   :  { %213 = vmatprep.subr.mxu0 %v23_v1  ;;  %226 = vmatprep.subr.mxu1 %v23_v1  ;;  %v197_v8 = vld [vmem:[%s336_s2] ss:$0 sm:$0xff] }
   0x5   :  { %214 = vmatpush3.msra.mxu0 %v23_v1  ;;  %230 = vmatpush3.msra.mxu1 %v23_v1  ;;  %v202_v20 = vld [vmem:[%s337_s3] ss:$0 sm:$0xff] }
   0x6   :  { %215 = vmatprep.subr.mxu0 %v22_v2  ;;  %227 = vmatprep.subr.mxu1 %v22_v2 }
   0x7   :  { %216 = vmatpush3.msra.mxu0 %v22_v2  ;;  %231 = vmatpush3.msra.mxu1 %v22_v2 }
   0x8   :  { %217 = vmatprep.subr.mxu0 %v21_v3  ;;  %228 = vmatprep.subr.mxu1 %v21_v3 }
   0x9   :  { %218 = vmatpush3.msra.mxu0 %v21_v3  ;;  %232 = vmatpush3.msra.mxu1 %v21_v3 }
   0xa   :  { %219 = vmatprep.mubr.msk.f32.mxu0 %vm32_vm0, %v287_v4  ;;  %222 = vmatprep.mubr.msk.f32.mxu1 %vm32_vm0, %v292_v5 }
   0xb   :  { %220 = vmatmul.mubr.msk.f32.vlgmr.msra.gmra.mxu0 %vm32_vm0, %v297_v6  ;;  %223 = vmatmul.mubr.msk.f32.vlgmr.msra.gmra.mxu1 %vm32_vm0, %v302_v7 }
  0xcb   :  { %v221_v9 = vpop.f32.mrf.mxu0  ;;  %v224_v10 = vpop.f32.mrf.mxu1 }
  0xcc   :  { %v117_v11 = vadd.f32 %v221_v9, %v197_v8  ;;  %v127_v12 = vadd.f32 %v224_v10, %v197_v8 }
  0xcd   :  { %v111_v13 = vpop.f32.mrf.mxu0  ;;  %v121_v14 = vpop.f32.mrf.mxu1 }
  0xce   :  { %233 = vtanh.f32 %v117_v11  ;;  %v112_v15 = vadd.f32 %v197_v8, %v111_v13  ;;  %v122_v16 = vadd.f32 %v197_v8, %v121_v14 }
  0xcf   :  { %235 = vtanh.f32 %v127_v12 }
  0xd0   :  { %237 = vtanh.f32 %v112_v15 }
  0xd1   :  { %239 = vtanh.f32 %v122_v16 }
  0xdb   :  { %v234_v17 = vpop.eup %233 }
  0xdc   :  { %v236_v18 = vpop.eup %235  ;;  %v142_v25 = vmul.f32 %v234_v17, %v202_v20 }
  0xdd   :  { %v238_v19 = vpop.eup %237  ;;  %v144_v27 = vmul.f32 %v236_v18, %v202_v20 }
  0xde   :  { %v240_v21 = vpop.eup %239  ;;  %v141_v22 = vmul.f32 %v238_v19, %v202_v20  ;;  %v148_v28 = vsel %vm32_vm0, %v142_v25, 0.0 }
  0xdf   :  { %v143_v23 = vmul.f32 %v240_v21, %v202_v20  ;;  %v154_v29 = vsel %vm32_vm0, %v144_v27, 0.0 }
  0xe0   :  { %v145_v24 = vsel %vm32_vm0, %v141_v22, 0.0 }
  0xe1   :  { %v151_v26 = vsel %vm32_vm0, %v143_v23, 0.0  ;;  %146 = vadd.xlane.f32.xlu0 %v145_v24 }
  0xe2   :  { %152 = vadd.xlane.f32.xlu1 %v151_v26 }
  0xe5   :  { %149 = vadd.xlane.f32.xlu0 %v148_v28 }
  0xe6   :  { %155 = vadd.xlane.f32.xlu1 %v154_v29 }
 0x16a   :  { %v147_v30 = vpop.xlane.xlu0 %146 }
 0x16b   :  { %v153_v31 = vpop.xlane.xlu1 %152 }
 0x16e   :  { %v150_v32 = vpop.xlane.xlu0 %149 }
 0x16f   :  { %v156_v33 = vpop.xlane.xlu1 %155  ;;  %v157_v34 = vadd.f32 %v150_v32, %v147_v30 }
 0x170   :  { %v166_v35 = vadd.f32 %v156_v33, %v153_v31 }
 0x171   :  { %v158_v36 = vrot.slane %v157_v34, 4 }
 0x172   :  { %v167_v37 = vrot.slane %v166_v35, 4 }
 0x173   :  { %v159_v38 = vadd.f32 %v158_v36, %v157_v34 }
 0x174   :  { %v168_v39 = vadd.f32 %v167_v37, %v166_v35 }
 0x175   :  { %v160_v40 = vrot.slane %v159_v38, 2 }
 0x176   :  { %v169_v41 = vrot.slane %v168_v39, 2 }
 0x177   :  { %v161_v42 = vadd.f32 %v160_v40, %v159_v38 }
 0x178   :  { %v170_v43 = vadd.f32 %v169_v41, %v168_v39 }
 0x179   :  { %v162_v44 = vrot.slane %v161_v42, 1 }
 0x17a   :  { %v171_v45 = vrot.slane %v170_v43, 1 }
 0x17b   :  { %v163_v46 = vadd.f32 %v162_v44, %v161_v42 }
 0x17c   :  { %v172_v47 = vadd.f32 %v171_v45, %v170_v43 }
 0x17d   :  { %v165_v48 = vmul.f32 0.0625, %v163_v46 }
 0x17e   :  { %v173_v49 = vmul.f32 0.0625, %v172_v47 }
 0x180   :  { %v174_v50 = vmax.f32 %v165_v48, %v173_v49 }
 0x182   :  { %v175_v51 = vsub.f32 %v165_v48, %v174_v50  ;;  %v178_v52 = vsub.f32 %v173_v49, %v174_v50 }
 0x184   :  { %v176_v53 = vmul.f32 1.442695, %v175_v51  ;;  %v179_v54 = vmul.f32 1.442695, %v178_v52 }
 0x186   :  { %241 = vpow2.f32 %v176_v53 }
 0x187   :  { %243 = vpow2.f32 %v179_v54 }
 0x193   :  { %v242_v55 = vpop.eup %241 }
 0x194   :  { %v244_v56 = vpop.eup %243 }
 0x195   :  { %v181_v57 = vadd.f32 %v244_v56, %v242_v55 }
 0x197   :  { %245 = vrcp.f32 %v181_v57 }
 0x1a4   :  { %v246_v58 = vpop.eup %245 }
 0x1a5   :  { %v183_v59 = vmul.f32 %v246_v58, %v242_v55  ;;  %v186_v60 = vmul.f32 %v246_v58, %v244_v56 }
 0x1a7   :  { %v184_v61 = vmul.f32 %v183_v59, %v287_v4  ;;  %v185_v62 = vmul.f32 %v183_v59, %v297_v6  ;;  %v187_v63 = vmul.f32 %v186_v60, %v292_v5  ;;  %v188_v0 = vmul.f32 %v186_v60, %v302_v7 }
 0x1a9   :  { %v189_v1 = vadd.f32 %v187_v63, %v184_v61  ;;  %v190_v2 = vadd.f32 %v188_v0, %v185_v62 }
 0x1ab   :  { %191 = vst.msk [vmem:[%s338_s4] sm:$0xff] %vm32_vm0, %v189_v1  ;;  %192 = vst.msk [vmem:[%s338_s4 + $0x8] sm:$0xff] %vm32_vm0, %v190_v2 }

// kernel: _lambda_.13
= control target key start
LH: loop header
LB: loop body
LE: loop exit
PB: predicated region body
PF: predicated region fallthrough
CT: control target
= control target key end

     0   :  { %v231_v0 = vmov 0.0   ;;  %vm232_vm0 = vmmov 0   ;;  %vm32_vm1 = vcmask 261120   ;;  %vm184_vm2 = vcmask 15360   ;;  %s304_s1 = inlined_call_operand.vmem [shape: f32[32,32], index: 1, kind: input, shape index: {}]   ;;  %s305_s0 = inlined_call_operand.vmem [shape: f32[8,32], index: 0, kind: input, shape index: {}]   ;;  %s306_s3 = inlined_call_operand.vmem [shape: f32[32,2], index: 3, kind: input, shape index: {}]   ;;  %s307_s2 = inlined_call_operand.vmem [shape: f32[1,32], index: 2, kind: input, shape index: {}]   ;;  %s308_s4 = inlined_call_operand.vmem [shape: f32[8,32], index: 4, kind: output, shape index: {0}]   ;;  %s309_s5 = inlined_call_operand.vmem [shape: f32[8,2], index: 5, kind: output, shape index: {1}]  }
   0x1   :  { %207 = vmatprep.subr.mxu0 %v231_v0  ;;  %v24_v1 = vld [vmem:[%s304_s1 + $0x18] sm:$0xff]  ;;  %v23_v2 = vld [vmem:[%s304_s1 + $0x10] sm:$0xff]  ;;  %215 = vmatprep.mubr.msk.f32.mxu0 %vm232_vm0, %v231_v0  ;;  %v19_v3 = vld [vmem:[%s305_s0] sm:$0xff] }
   0x2   :  { %208 = vmatpush3.msra.mxu0 %v24_v1  ;;  %218 = vmatprep.subr.mxu1 %v231_v0  ;;  %v110_v4 = vld [vmem:[%s306_s3 + $0x18] sm:$0xff]  ;;  %v22_v5 = vld [vmem:[%s304_s1 + $0x8] sm:$0xff]  ;;  %v109_v6 = vld [vmem:[%s306_s3 + $0x10] sm:$0xff]  ;;  %v20_v8 = vmax.f32 %v19_v3, 0.0 }
   0x3   :  { %209 = vmatprep.subr.mxu0 %v231_v0  ;;  %219 = vmatpush3.msra.mxu1 %v110_v4  ;;  %v21_v7 = vld [vmem:[%s304_s1] sm:$0xff]  ;;  %v108_v9 = vld [vmem:[%s306_s3 + $0x8] sm:$0xff] }
   0x4   :  { %210 = vmatpush3.msra.mxu0 %v23_v2  ;;  %220 = vmatprep.subr.mxu1 %v231_v0  ;;  %v107_v10 = vld [vmem:[%s306_s3] sm:$0xff] }
   0x5   :  { %211 = vmatprep.subr.mxu0 %v231_v0  ;;  %221 = vmatpush3.msra.mxu1 %v109_v6  ;;  %v194_v11 = vld [vmem:[%s307_s2] ss:$0 sm:$0xff] }
   0x6   :  { %212 = vmatpush3.msra.mxu0 %v22_v5  ;;  %222 = vmatprep.subr.mxu1 %v231_v0 }
   0x7   :  { %213 = vmatprep.subr.mxu0 %v231_v0  ;;  %226 = vmatprep.mubr.msk.f32.mxu1 %vm232_vm0, %v231_v0 }
   0x8   :  { %214 = vmatpush3.msra.mxu0 %v21_v7  ;;  %223 = vmatpush3.msra.mxu1 %v108_v9 }
   0x9   :  { %216 = vmatmul.mubr.msk.f32.vlgmr.msra.gmra.mxu0 %vm32_vm1, %v20_v8  ;;  %224 = vmatprep.subr.mxu1 %v231_v0 }
   0xa   :  { %225 = vmatpush3.msra.mxu1 %v107_v10 }
  0xc9   :  { %v102_v12 = vpop.f32.mrf.mxu0 }
  0xca   :  { %v103_v13 = vadd.f32 %v194_v11, %v102_v12 }
  0xcb   :  { %v217_v14 = vpop.f32.mrf.mxu0 }
  0xcc   :  { %106 = vst.msk [vmem:[%s308_s4] sm:$0xff] %vm32_vm1, %v103_v13  ;;  %227 = vmatmul.mubr.msk.f32.vlgmr.msra.gmra.mxu1 %vm32_vm1, %v103_v13 }
 0x18c   :  { %v180_v15 = vpop.f32.mrf.mxu1 }
 0x18d   :  { %185 = vst.msk [vmem:[%s309_s5] sm:$0xff] %vm184_vm2, %v180_v15 }
 0x18e   :  { %v228_v16 = vpop.f32.mrf.mxu1 }

// kernel: _lambda_.17
= control target key start
LH: loop header
LB: loop body
LE: loop exit
PB: predicated region body
PF: predicated region fallthrough
CT: control target
= control target key end

     0   :  { %vm27_vm0 = vcmask 261120   ;;  %vm109_vm1 = vcmask 64512   ;;  %s185_s1 = inlined_call_operand.vmem [shape: f32[32,8], index: 1, kind: input, shape index: {}]   ;;  %s186_s0 = inlined_call_operand.vmem [shape: f32[16,32], index: 0, kind: input, shape index: {}]   ;;  %s187_s2 = inlined_call_operand.vmem [shape: f32[1,8], index: 2, kind: input, shape index: {}]   ;;  %s188_s3 = inlined_call_operand.vmem [shape: f32[16,8], index: 3, kind: output, shape index: {}]  }
   0x1   :  { %v19_v0 = vld [vmem:[%s185_s1 + $0x18] sm:$0xff]  ;;  %v18_v1 = vld [vmem:[%s185_s1 + $0x10] sm:$0xff]  ;;  %v14_v2 = vld [vmem:[%s186_s0] sm:$0xff] }
   0x2   :  { %125 = vmatprep.subr.mxu0 %v19_v0  ;;  %v17_v3 = vld [vmem:[%s185_s1 + $0x8] sm:$0xff]  ;;  %133 = vmatprep.mubr.msk.f32.mxu0 %vm27_vm0, %v14_v2  ;;  %v16_v4 = vld [vmem:[%s185_s1] sm:$0xff] }
   0x3   :  { %126 = vmatpush3.msra.mxu0 %v19_v0  ;;  %v15_v5 = vld [vmem:[%s186_s0 + $0x8] sm:$0xff]  ;;  %v116_v6 = vld [vmem:[%s187_s2] ss:$0 sm:$0xff] }
   0x4   :  { %127 = vmatprep.subr.mxu0 %v18_v1 }
   0x5   :  { %128 = vmatpush3.msra.mxu0 %v18_v1 }
   0x6   :  { %129 = vmatprep.subr.mxu0 %v17_v3 }
   0x7   :  { %130 = vmatpush3.msra.mxu0 %v17_v3 }
   0x8   :  { %131 = vmatprep.subr.mxu0 %v16_v4 }
   0x9   :  { %132 = vmatpush3.msra.mxu0 %v16_v4 }
   0xa   :  { %134 = vmatmul.mubr.msk.f32.vlgmr.msra.gmra.mxu0 %vm27_vm0, %v15_v5 }
  0xca   :  { %v135_v7 = vpop.f32.mrf.mxu0 }
  0xcb   :  { %v106_v8 = vadd.f32 %v135_v7, %v116_v6 }
  0xcc   :  { %v100_v9 = vpop.f32.mrf.mxu0 }
  0xcd   :  { %111 = vst.msk [vmem:[%s188_s3 + $0x8] sm:$0xff] %vm109_vm1, %v106_v8  ;;  %v101_v10 = vadd.f32 %v116_v6, %v100_v9 }
  0xcf   :  { %110 = vst.msk [vmem:[%s188_s3] sm:$0xff] %vm109_vm1, %v101_v10 }

// kernel: _lambda_.14
= control target key start
LH: loop header
LB: loop body
LE: loop exit
PB: predicated region body
PF: predicated region fallthrough
CT: control target
= control target key end

     0   :  { %vm34_vm0 = vcmask 261120   ;;  %vm203_vm1 = vcmask 31744   ;;  %s334_s1 = inlined_call_operand.vmem [shape: f32[32,32], index: 1, kind: input, shape index: {}]   ;;  %s335_s0 = inlined_call_operand.vmem [shape: f32[16,32], index: 0, kind: input, shape index: {}]   ;;  %s336_s3 = inlined_call_operand.vmem [shape: f32[32,4], index: 3, kind: input, shape index: {}]   ;;  %s337_s2 = inlined_call_operand.vmem [shape: f32[1,32], index: 2, kind: input, shape index: {}]   ;;  %s338_s4 = inlined_call_operand.vmem [shape: f32[16,32], index: 4, kind: output, shape index: {0}]   ;;  %s339_s5 = inlined_call_operand.vmem [shape: f32[16,4], index: 5, kind: output, shape index: {1}]  }
   0x1   :  { %v26_v0 = vld [vmem:[%s334_s1 + $0x18] sm:$0xff]  ;;  %v25_v1 = vld [vmem:[%s334_s1 + $0x10] sm:$0xff]  ;;  %v19_v2 = vld [vmem:[%s335_s0] sm:$0xff] }
   0x2   :  { %231 = vmatprep.subr.mxu0 %v26_v0  ;;  %v24_v3 = vld [vmem:[%s334_s1 + $0x8] sm:$0xff]  ;;  %v21_v5 = vmax.f32 %v19_v2, 0.0  ;;  %v121_v6 = vld [vmem:[%s336_s3 + $0x18] sm:$0xff]  ;;  %v23_v7 = vld [vmem:[%s334_s1] sm:$0xff] }
   0x3   :  { %232 = vmatpush3.msra.mxu0 %v26_v0  ;;  %v20_v4 = vld [vmem:[%s335_s0 + $0x8] sm:$0xff]  ;;  %242 = vmatprep.subr.mxu1 %v121_v6  ;;  %v120_v9 = vld [vmem:[%s336_s3 + $0x10] sm:$0xff]  ;;  %v118_v11 = vld [vmem:[%s336_s3] sm:$0xff] }
   0x4   :  { %233 = vmatprep.subr.mxu0 %v25_v1  ;;  %239 = vmatprep.mubr.msk.f32.mxu0 %vm34_vm0, %v21_v5  ;;  %v22_v8 = vmax.f32 %v20_v4, 0.0  ;;  %v119_v10 = vld [vmem:[%s336_s3 + $0x8] sm:$0xff]  ;;  %v214_v12 = vld [vmem:[%s337_s2] ss:$0 sm:$0xff] }
   0x5   :  { %234 = vmatpush3.msra.mxu0 %v25_v1  ;;  %243 = vmatpush3.msra.mxu1 %v121_v6 }
   0x6   :  { %235 = vmatprep.subr.mxu0 %v24_v3  ;;  %244 = vmatprep.subr.mxu1 %v120_v9 }
   0x7   :  { %236 = vmatpush3.msra.mxu0 %v24_v3  ;;  %245 = vmatpush3.msra.mxu1 %v120_v9 }
   0x8   :  { %237 = vmatprep.subr.mxu0 %v23_v7  ;;  %246 = vmatprep.subr.mxu1 %v119_v10 }
   0x9   :  { %238 = vmatpush3.msra.mxu0 %v23_v7  ;;  %247 = vmatpush3.msra.mxu1 %v119_v10 }
   0xa   :  { %240 = vmatmul.mubr.msk.f32.vlgmr.msra.gmra.mxu0 %vm34_vm0, %v22_v8  ;;  %248 = vmatprep.subr.mxu1 %v118_v11 }
   0xb   :  { %249 = vmatpush3.msra.mxu1 %v118_v11 }
  0xca   :  { %v241_v13 = vpop.f32.mrf.mxu0 }
  0xcb   :  { %v113_v14 = vadd.f32 %v241_v13, %v214_v12 }
  0xcc   :  { %v107_v15 = vpop.f32.mrf.mxu0 }
  0xcd   :  { %117 = vst.msk [vmem:[%s338_s4 + $0x8] sm:$0xff] %vm34_vm0, %v113_v14  ;;  %v108_v16 = vadd.f32 %v214_v12, %v107_v15 }
  0xcf   :  { %116 = vst.msk [vmem:[%s338_s4] sm:$0xff] %vm34_vm0, %v108_v16  ;;  %250 = vmatprep.mubr.msk.f32.mxu1 %vm34_vm0, %v108_v16 }
  0xd0   :  { %251 = vmatmul.mubr.msk.f32.vlgmr.msra.gmra.mxu1 %vm34_vm0, %v113_v14 }
 0x190   :  { %v252_v17 = vpop.f32.mrf.mxu1 }
 0x191   :  { %205 = vst.msk [vmem:[%s339_s5 + $0x8] sm:$0xff] %vm203_vm1, %v252_v17 }
 0x192   :  { %v194_v18 = vpop.f32.mrf.mxu1 }
 0x193   :  { %204 = vst.msk [vmem:[%s339_s5] sm:$0xff] %vm203_vm1, %v194_v18 }

</bundles_post_ra>
